<compile_context>
chip_gen: v7x
topology: tpu7x:2x2x1
jax: 0.10.0
libtpu: 0.0.40
codegen_flags: <defaults>
</compile_context>

<pallas_src>
import jax
import jax.numpy as jnp
from jax.experimental import pallas as pl
from jax.experimental.pallas import tpu as pltpu

_NEG_BIG = -1e30  # bias for padded fc3 lanes -> exp(logit - max) underflows to 0


def _round_up(x, m):
    return ((x + m - 1) // m) * m


def _tpu_vmem_capacity_bytes(default=64 << 20):
    """Physical per-core VMEM; conservative (v7x-sized) default if query fails."""
    try:
        cap = getattr(pltpu.get_tpu_info(), "vmem_capacity_bytes", None)
        if cap:
            return int(cap)
    except Exception:
        pass
    return default


def _mxu_lane_multiple():
    """256-lane alignment for the 2x256x256 MXU (v6e/v7x); 128 on older chips."""
    try:
        kind = jax.devices()[0].device_kind.lower()
        for tag in ("v2", "v3", "v4", "v5"):
            if tag in kind:
                return 128
    except Exception:
        pass
    return 256


def _pad_feature(d, lane):
    # <=128 stays one 128-lane vreg; larger dims align to the MXU width.
    return 128 if d <= 128 else _round_up(d, lane)


def _vmem_need_bytes(tm, in_p, h_p, o_p, x_bytes, w_bytes, out_bytes, weight_buffers):
    tiles = 2 * tm * (in_p * x_bytes + o_p * out_bytes)          # double-buffered x / out tiles
    weights = weight_buffers * (
        (in_p * h_p + h_p * h_p + h_p * o_p) * w_bytes + (2 * h_p + o_p) * 4)
    inter = 2 * tm * h_p * (4 + w_bytes) + 2 * tm * o_p * 4      # h1/h2 (f32 + cdt), logits/e
    return tiles + weights + inter + (4 << 20)                   # + headroom


def mlp_kernel(x_ref, w1_ref, b1_ref, w2_ref, b2_ref, w3_ref, b3_ref, o_ref):
    cdt = w1_ref.dtype
    # Cast x in-kernel (VPU, hidden under the matmuls) so the wrapper never
    # needs a separate cast/copy pass over the activations.
    x = x_ref[...].astype(cdt)

    # fc1 + relu (MXU matmul in compute dtype, f32 accumulate; epilogue in f32)
    h1 = jnp.dot(x, w1_ref[...], preferred_element_type=jnp.float32) + b1_ref[...]
    h1 = jnp.maximum(h1, 0.0).astype(cdt)

    # fc2 + relu
    # TODO(synk): for very large H (resident bf16 W2 > ~24 MiB on v7x) add a
    # contraction grid axis + f32 VMEM accumulator so W1/W2 stream in tiles.
    h2 = jnp.dot(h1, w2_ref[...], preferred_element_type=jnp.float32) + b2_ref[...]
    h2 = jnp.maximum(h2, 0.0).astype(cdt)

    # fc3 + numerically stable softmax over the lane-dense (padded) feature axis.
    # Padded lanes have bias = -1e30 so they contribute exactly 0 after exp.
    logits = jnp.dot(h2, w3_ref[...], preferred_element_type=jnp.float32) + b3_ref[...]
    m = jnp.max(logits, axis=-1, keepdims=True)
    e = jnp.exp(logits - m)
    denom = jnp.sum(e, axis=-1, keepdims=True)
    o_ref[...] = (e * pl.reciprocal(denom, approx=True)).astype(o_ref.dtype)


def prepare_params(params, *, compute_dtype=jnp.bfloat16):
    """Pad + cast the MLP parameters ONCE (outside the hot path).

    Weights are [in, out]; biases [1, out].  Zero padding is inert through
    matmul + relu; padded fc3 lanes carry a -1e30 bias so softmax assigns them
    exactly zero probability.
    """
    w1, b1, w2, b2, w3, b3 = (params[k] for k in ("w1", "b1", "w2", "b2", "w3", "b3"))
    In, H = w1.shape
    O = w3.shape[1]
    lane = _mxu_lane_multiple()
    in_p = _pad_feature(In, lane)
    h_p = _pad_feature(H, lane)
    o_p = _pad_feature(O, 128)

    cdt = jnp.dtype(compute_dtype)
    f32 = jnp.float32
    return {
        "w1": jnp.zeros((in_p, h_p), cdt).at[:In, :H].set(w1.astype(cdt)),
        "b1": jnp.zeros((1, h_p), f32).at[:, :H].set(b1.reshape(1, -1).astype(f32)),
        "w2": jnp.zeros((h_p, h_p), cdt).at[:H, :H].set(w2.astype(cdt)),
        "b2": jnp.zeros((1, h_p), f32).at[:, :H].set(b2.reshape(1, -1).astype(f32)),
        "w3": jnp.zeros((h_p, o_p), cdt).at[:H, :O].set(w3.astype(cdt)),
        "b3": jnp.full((1, o_p), _NEG_BIG, f32).at[:, :O].set(b3.reshape(1, -1).astype(f32)),
        "dims": (In, H, O),
        "padded": (in_p, h_p, o_p),
        "compute_dtype": cdt,
    }


def mlp_forward(x, packed, *, tm=None, out_dtype=None, single_buffer_weights=True):
    """x: [B, inputsize].  packed: output of prepare_params (pre-padded weights)."""
    In, H, O = packed["dims"]
    in_p, h_p, o_p = packed["padded"]
    cdt = packed["compute_dtype"]
    assert x.ndim == 2 and x.shape[1] == In
    B = x.shape[0]

    out_dtype = jnp.dtype(cdt if out_dtype is None else out_dtype)
    x_bytes = jnp.dtype(x.dtype).itemsize
    w_bytes = jnp.dtype(cdt).itemsize
    out_bytes = out_dtype.itemsize

    vmem_cap = _tpu_vmem_capacity_bytes()
    budget = int(0.85 * vmem_cap)          # ~108 MiB on v5e/v6e, ~54 MiB on v7x
    weight_buffers = 1 if single_buffer_weights else 2

    # Batch tile: bigger on 128-MiB-VMEM chips (v5e/v6e), smaller on v7x; split
    # into >=2 grid steps whenever the batch allows so the "parallel" axis can
    # shard across v7x's two TensorCores and the tile DMAs pipeline.
    if tm is None:
        tm = 512 if vmem_cap >= (100 << 20) else 256
    b_aligned = _round_up(B, 128)
    tm_eff = min(_round_up(tm, 128), b_aligned)
    if b_aligned >= 256:
        tm_eff = min(tm_eff, max(128, ((b_aligned // 2) // 128) * 128))
    while tm_eff > 128 and _vmem_need_bytes(
            tm_eff, in_p, h_p, o_p, x_bytes, w_bytes, out_bytes, weight_buffers) > budget:
        tm_eff -= 128
    b_p = _round_up(B, tm_eff)

    # Feed x straight through when it is already tile/lane aligned; only ragged
    # shapes pay for a zero-padded copy (dtype cast happens inside the kernel).
    if b_p == B and in_p == In:
        x_in = x
    else:
        x_in = jnp.zeros((b_p, in_p), x.dtype).at[:B, :In].set(x)

    grid = (b_p // tm_eff,)
    const = lambda i: (0, 0)  # weights / biases stay resident across batch tiles

    cost = pl.CostEstimate(
        flops=2 * b_p * (in_p * h_p + h_p * h_p + h_p * o_p),
        transcendentals=b_p * o_p,
        bytes_accessed=(
            b_p * in_p * x_bytes
            + (in_p * h_p + h_p * h_p + h_p * o_p) * w_bytes
            + (2 * h_p + o_p) * 4
            + b_p * o_p * out_bytes
        ),
    )

    def build(n_weight_buffers):
        pipeline_mode = pl.Buffered(1) if n_weight_buffers == 1 else None

        def wspec(shape):
            if pipeline_mode is None:
                return pl.BlockSpec(shape, const)
            return pl.BlockSpec(shape, const, pipeline_mode=pipeline_mode)

        need = _vmem_need_bytes(tm_eff, in_p, h_p, o_p, x_bytes, w_bytes,
                                out_bytes, n_weight_buffers)
        vmem_limit = int(min(max(need, 32 << 20), budget))
        return pl.pallas_call(
            mlp_kernel,
            out_shape=jax.ShapeDtypeStruct((b_p, o_p), out_dtype),
            grid_spec=pltpu.PrefetchScalarGridSpec(
                num_scalar_prefetch=0,
                grid=grid,
                in_specs=[
                    pl.BlockSpec((tm_eff, in_p), lambda i: (i, 0)),  # x tile over batch
                    wspec((in_p, h_p)),   # W1 (resident)
                    wspec((1, h_p)),      # b1
                    wspec((h_p, h_p)),    # W2
                    wspec((1, h_p)),      # b2
                    wspec((h_p, o_p)),    # W3
                    wspec((1, o_p)),      # b3
                ],
                out_specs=pl.BlockSpec((tm_eff, o_p), lambda i: (i, 0)),
            ),
            compiler_params=pltpu.CompilerParams(
                dimension_semantics=("parallel",),  # batch tiles shard across v7x's 2 TCs
                vmem_limit_bytes=vmem_limit,
            ),
            cost_estimate=cost,
        )

    args = (x_in, packed["w1"], packed["b1"], packed["w2"], packed["b2"],
            packed["w3"], packed["b3"])
    if single_buffer_weights:
        try:
            out_p = build(1)(*args)
        except Exception:
            # Fallback if this Pallas build rejects single-buffered (Buffered(1)) specs.
            out_p = build(2)(*args)
    else:
        out_p = build(2)(*args)

    return out_p[:B, :O]


def init_params(key, inputsize, hiddensize, outsize=2):
    """Deterministic synthetic parameters (weights stored as [in, out])."""
    k1, k2, k3, k4, k5, k6 = jax.random.split(key, 6)
    s = 0.1
    return {
        "w1": jax.random.normal(k1, (inputsize, hiddensize), jnp.float32) * s,
        "b1": jax.random.normal(k2, (1, hiddensize), jnp.float32) * s,
        "w2": jax.random.normal(k3, (hiddensize, hiddensize), jnp.float32) * s,
        "b2": jax.random.normal(k4, (1, hiddensize), jnp.float32) * s,
        "w3": jax.random.normal(k5, (hiddensize, outsize), jnp.float32) * s,
        "b3": jax.random.normal(k6, (1, outsize), jnp.float32) * s,
    }


def mlp_reference(x, params):
    h1 = jnp.maximum(x @ params["w1"] + params["b1"], 0.0)
    h2 = jnp.maximum(h1 @ params["w2"] + params["b2"], 0.0)
    logits = h2 @ params["w3"] + params["b3"]
    return jax.nn.softmax(logits, axis=1)


if __name__ == "__main__":
    key = jax.random.PRNGKey(0)
    kx, kp = jax.random.split(key)

    batch, inputsize, hiddensize = 8, 32, 32
    x = jax.random.normal(kx, (batch, inputsize), jnp.float32)
    params = init_params(kp, inputsize, hiddensize)

    ref = mlp_reference(x, params)

    # f32 compute path (tight tolerance; exercises padding + lane-dense store).
    packed_f32 = prepare_params(params, compute_dtype=jnp.float32)
    out_f32 = jax.block_until_ready(mlp_forward(x, packed_f32))
    assert out_f32.shape == (batch, 2)
    assert out_f32.dtype == jnp.float32
    assert jnp.allclose(out_f32, ref, atol=2e-3, rtol=2e-3)
    assert jnp.allclose(jnp.sum(out_f32, axis=1), 1.0, atol=1e-2)

    # bf16 MXU path (fast path on v6e/v7x; f32 accumulation, bf16 output).
    packed_bf16 = prepare_params(params, compute_dtype=jnp.bfloat16)
    out_bf16 = jax.block_until_ready(mlp_forward(x, packed_bf16))
    assert out_bf16.shape == (batch, 2)
    out_bf16_f32 = out_bf16.astype(jnp.float32)
    assert jnp.allclose(out_bf16_f32, ref, atol=3e-2, rtol=3e-2)
    assert jnp.allclose(jnp.sum(out_bf16_f32, axis=1), 1.0, atol=2e-2)

    # Second call reuses the cached packed params (no repadding/recasting pass).
    out2 = jax.block_until_ready(mlp_forward(x, packed_bf16))
    assert jnp.allclose(out2.astype(jnp.float32), out_bf16_f32, atol=1e-6)

    print("KERNEL_OK")
</pallas_src>

<mosaic_0001>
module attributes {stable_mosaic.version = 11 : i64} {
  func.func @mlp_kernel(%arg0: i32, %arg1: memref<128x128xf32, #tpu.memory_space<vmem>>, %arg2: memref<128x128xf32, #tpu.memory_space<vmem>>, %arg3: memref<1x128xf32, #tpu.memory_space<vmem>>, %arg4: memref<128x128xf32, #tpu.memory_space<vmem>>, %arg5: memref<1x128xf32, #tpu.memory_space<vmem>>, %arg6: memref<128x128xf32, #tpu.memory_space<vmem>>, %arg7: memref<1x128xf32, #tpu.memory_space<vmem>>, %arg8: memref<128x128xf32, #tpu.memory_space<vmem>>) attributes {dimension_semantics = [#tpu.dimension_semantics<parallel>], iteration_bounds = array<i64: 1>, scalar_prefetch = 0 : i64, scratch_operands = 0 : i64, tpu.core_type = #tpu.core_type<tc>, window_params = [{transform_indices = @transform_0, window_bounds = array<i64: 128, 128>}, {pipeline_mode = #tpu.pipeline_mode<synchronous>, transform_indices = @transform_1, window_bounds = array<i64: 128, 128>}, {pipeline_mode = #tpu.pipeline_mode<synchronous>, transform_indices = @transform_2, window_bounds = array<i64: 1, 128>}, {pipeline_mode = #tpu.pipeline_mode<synchronous>, transform_indices = @transform_3, window_bounds = array<i64: 128, 128>}, {pipeline_mode = #tpu.pipeline_mode<synchronous>, transform_indices = @transform_4, window_bounds = array<i64: 1, 128>}, {pipeline_mode = #tpu.pipeline_mode<synchronous>, transform_indices = @transform_5, window_bounds = array<i64: 128, 128>}, {pipeline_mode = #tpu.pipeline_mode<synchronous>, transform_indices = @transform_6, window_bounds = array<i64: 1, 128>}, {transform_indices = @transform_7, window_bounds = array<i64: 128, 128>}]} {
    %c0 = arith.constant 0 : index
    %c0_0 = arith.constant 0 : index
    %0 = vector.load %arg1[%c0, %c0_0] : memref<128x128xf32, #tpu.memory_space<vmem>>, vector<128x128xf32>
    %c0_1 = arith.constant 0 : index
    %c0_2 = arith.constant 0 : index
    %1 = vector.load %arg2[%c0_1, %c0_2] : memref<128x128xf32, #tpu.memory_space<vmem>>, vector<128x128xf32>
    %cst = arith.constant dense<0.000000e+00> : vector<128x128xf32>
    %2 = tpu.matmul %0, %1, %cst {dimension_numbers = #tpu.dot_dimension_numbers<[1], [0], [0], [1], [0, 0, 1, 1], [], []>} : vector<128x128xf32>, vector<128x128xf32>, vector<128x128xf32> -> vector<128x128xf32>
    %c0_3 = arith.constant 0 : index
    %c0_4 = arith.constant 0 : index
    %3 = vector.load %arg3[%c0_3, %c0_4] : memref<1x128xf32, #tpu.memory_space<vmem>>, vector<1x128xf32>
    %4 = vector.broadcast %3 : vector<1x128xf32> to vector<128x128xf32>
    %5 = arith.addf %2, %4 : vector<128x128xf32>
    %cst_5 = arith.constant 0.000000e+00 : f32
    %6 = vector.broadcast %cst_5 : f32 to vector<128x128xf32>
    %7 = arith.maximumf %5, %6 : vector<128x128xf32>
    %c0_6 = arith.constant 0 : index
    %c0_7 = arith.constant 0 : index
    %8 = vector.load %arg4[%c0_6, %c0_7] : memref<128x128xf32, #tpu.memory_space<vmem>>, vector<128x128xf32>
    %cst_8 = arith.constant dense<0.000000e+00> : vector<128x128xf32>
    %9 = tpu.matmul %7, %8, %cst_8 {dimension_numbers = #tpu.dot_dimension_numbers<[1], [0], [0], [1], [0, 0, 1, 1], [], []>} : vector<128x128xf32>, vector<128x128xf32>, vector<128x128xf32> -> vector<128x128xf32>
    %c0_9 = arith.constant 0 : index
    %c0_10 = arith.constant 0 : index
    %10 = vector.load %arg5[%c0_9, %c0_10] : memref<1x128xf32, #tpu.memory_space<vmem>>, vector<1x128xf32>
    %11 = vector.broadcast %10 : vector<1x128xf32> to vector<128x128xf32>
    %12 = arith.addf %9, %11 : vector<128x128xf32>
    %cst_11 = arith.constant 0.000000e+00 : f32
    %13 = vector.broadcast %cst_11 : f32 to vector<128x128xf32>
    %14 = arith.maximumf %12, %13 : vector<128x128xf32>
    %c0_12 = arith.constant 0 : index
    %c0_13 = arith.constant 0 : index
    %15 = vector.load %arg6[%c0_12, %c0_13] : memref<128x128xf32, #tpu.memory_space<vmem>>, vector<128x128xf32>
    %cst_14 = arith.constant dense<0.000000e+00> : vector<128x128xf32>
    %16 = tpu.matmul %14, %15, %cst_14 {dimension_numbers = #tpu.dot_dimension_numbers<[1], [0], [0], [1], [0, 0, 1, 1], [], []>} : vector<128x128xf32>, vector<128x128xf32>, vector<128x128xf32> -> vector<128x128xf32>
    %c0_15 = arith.constant 0 : index
    %c0_16 = arith.constant 0 : index
    %17 = vector.load %arg7[%c0_15, %c0_16] : memref<1x128xf32, #tpu.memory_space<vmem>>, vector<1x128xf32>
    %18 = vector.broadcast %17 : vector<1x128xf32> to vector<128x128xf32>
    %19 = arith.addf %16, %18 : vector<128x128xf32>
    %cst_17 = arith.constant dense<0xFF800000> : vector<128xf32>
    %20 = vector.multi_reduction <maximumf>, %19, %cst_17 [1] : vector<128x128xf32> to vector<128xf32>
    %21 = vector.shape_cast %20 : vector<128xf32> to vector<128x1xf32>
    %22 = vector.broadcast %21 : vector<128x1xf32> to vector<128x128xf32>
    %23 = arith.subf %19, %22 : vector<128x128xf32>
    %24 = math.exp %23 : vector<128x128xf32>
    %cst_18 = arith.constant dense<0.000000e+00> : vector<128xf32>
    %25 = vector.multi_reduction <add>, %24, %cst_18 [1] : vector<128x128xf32> to vector<128xf32>
    %26 = vector.shape_cast %25 : vector<128xf32> to vector<128x1xf32>
    %27 = tpu.reciprocal %26 {approx = true} : vector<128x1xf32> -> vector<128x1xf32>
    %28 = vector.broadcast %27 : vector<128x1xf32> to vector<128x128xf32>
    %29 = arith.mulf %24, %28 : vector<128x128xf32>
    %c0_19 = arith.constant 0 : index
    %c0_20 = arith.constant 0 : index
    %30 = vector.load %arg8[%c0_19, %c0_20] : memref<128x128xf32, #tpu.memory_space<vmem>>, vector<128x128xf32>
    tpu.vector_store %arg8[%c0_19, %c0_20], %29 {strides = array<i32>} : memref<128x128xf32, #tpu.memory_space<vmem>>, vector<128x128xf32>,
    return
  }
  func.func @transform_0(%arg0: i32) -> (i32, i32) {
    %c0_i32 = arith.constant 0 : i32
    %c0_i32_0 = arith.constant 0 : i32
    return %arg0, %c0_i32 : i32, i32
  }
  func.func @transform_1(%arg0: i32) -> (i32, i32) {
    %c0_i32 = arith.constant 0 : i32
    %c0_i32_0 = arith.constant 0 : i32
    %c0_i32_1 = arith.constant 0 : i32
    return %c0_i32, %c0_i32_0 : i32, i32
  }
  func.func @transform_2(%arg0: i32) -> (i32, i32) {
    %c0_i32 = arith.constant 0 : i32
    %c0_i32_0 = arith.constant 0 : i32
    %c0_i32_1 = arith.constant 0 : i32
    return %c0_i32, %c0_i32_0 : i32, i32
  }
  func.func @transform_3(%arg0: i32) -> (i32, i32) {
    %c0_i32 = arith.constant 0 : i32
    %c0_i32_0 = arith.constant 0 : i32
    %c0_i32_1 = arith.constant 0 : i32
    return %c0_i32, %c0_i32_0 : i32, i32
  }
  func.func @transform_4(%arg0: i32) -> (i32, i32) {
    %c0_i32 = arith.constant 0 : i32
    %c0_i32_0 = arith.constant 0 : i32
    %c0_i32_1 = arith.constant 0 : i32
    return %c0_i32, %c0_i32_0 : i32, i32
  }
  func.func @transform_5(%arg0: i32) -> (i32, i32) {
    %c0_i32 = arith.constant 0 : i32
    %c0_i32_0 = arith.constant 0 : i32
    %c0_i32_1 = arith.constant 0 : i32
    return %c0_i32, %c0_i32_0 : i32, i32
  }
  func.func @transform_6(%arg0: i32) -> (i32, i32) {
    %c0_i32 = arith.constant 0 : i32
    %c0_i32_0 = arith.constant 0 : i32
    %c0_i32_1 = arith.constant 0 : i32
    return %c0_i32, %c0_i32_0 : i32, i32
  }
  func.func @transform_7(%arg0: i32) -> (i32, i32) {
    %c0_i32 = arith.constant 0 : i32
    %c0_i32_0 = arith.constant 0 : i32
    return %arg0, %c0_i32 : i32, i32
  }
}

module attributes {stable_mosaic.version = 11 : i64} {
  func.func @mlp_kernel(%arg0: i32, %arg1: memref<128x128xf32, #tpu.memory_space<vmem>>, %arg2: memref<128x128xf32, #tpu.memory_space<vmem>>, %arg3: memref<1x128xf32, #tpu.memory_space<vmem>>, %arg4: memref<128x128xf32, #tpu.memory_space<vmem>>, %arg5: memref<1x128xf32, #tpu.memory_space<vmem>>, %arg6: memref<128x128xf32, #tpu.memory_space<vmem>>, %arg7: memref<1x128xf32, #tpu.memory_space<vmem>>, %arg8: memref<128x128xf32, #tpu.memory_space<vmem>>) attributes {dimension_semantics = [#tpu.dimension_semantics<parallel>], iteration_bounds = array<i64: 1>, scalar_prefetch = 0 : i64, scratch_operands = 0 : i64, tpu.core_type = #tpu.core_type<tc>, window_params = [{transform_indices = @transform_0, window_bounds = array<i64: 128, 128>}, {pipeline_mode = #tpu.pipeline_mode<synchronous>, transform_indices = @transform_1, window_bounds = array<i64: 128, 128>}, {pipeline_mode = #tpu.pipeline_mode<synchronous>, transform_indices = @transform_2, window_bounds = array<i64: 1, 128>}, {pipeline_mode = #tpu.pipeline_mode<synchronous>, transform_indices = @transform_3, window_bounds = array<i64: 128, 128>}, {pipeline_mode = #tpu.pipeline_mode<synchronous>, transform_indices = @transform_4, window_bounds = array<i64: 1, 128>}, {pipeline_mode = #tpu.pipeline_mode<synchronous>, transform_indices = @transform_5, window_bounds = array<i64: 128, 128>}, {pipeline_mode = #tpu.pipeline_mode<synchronous>, transform_indices = @transform_6, window_bounds = array<i64: 1, 128>}, {transform_indices = @transform_7, window_bounds = array<i64: 128, 128>}]} {
    %c0 = arith.constant 0 : index
    %c0_0 = arith.constant 0 : index
    %0 = vector.load %arg1[%c0, %c0_0] : memref<128x128xf32, #tpu.memory_space<vmem>>, vector<128x128xf32>
    %c0_1 = arith.constant 0 : index
    %c0_2 = arith.constant 0 : index
    %1 = vector.load %arg2[%c0_1, %c0_2] : memref<128x128xf32, #tpu.memory_space<vmem>>, vector<128x128xf32>
    %cst = arith.constant dense<0.000000e+00> : vector<128x128xf32>
    %2 = tpu.matmul %0, %1, %cst {dimension_numbers = #tpu.dot_dimension_numbers<[1], [0], [0], [1], [0, 0, 1, 1], [], []>} : vector<128x128xf32>, vector<128x128xf32>, vector<128x128xf32> -> vector<128x128xf32>
    %c0_3 = arith.constant 0 : index
    %c0_4 = arith.constant 0 : index
    %3 = vector.load %arg3[%c0_3, %c0_4] : memref<1x128xf32, #tpu.memory_space<vmem>>, vector<1x128xf32>
    %4 = vector.broadcast %3 : vector<1x128xf32> to vector<128x128xf32>
    %5 = arith.addf %2, %4 : vector<128x128xf32>
    %cst_5 = arith.constant 0.000000e+00 : f32
    %6 = vector.broadcast %cst_5 : f32 to vector<128x128xf32>
    %7 = arith.maximumf %5, %6 : vector<128x128xf32>
    %c0_6 = arith.constant 0 : index
    %c0_7 = arith.constant 0 : index
    %8 = vector.load %arg4[%c0_6, %c0_7] : memref<128x128xf32, #tpu.memory_space<vmem>>, vector<128x128xf32>
    %cst_8 = arith.constant dense<0.000000e+00> : vector<128x128xf32>
    %9 = tpu.matmul %7, %8, %cst_8 {dimension_numbers = #tpu.dot_dimension_numbers<[1], [0], [0], [1], [0, 0, 1, 1], [], []>} : vector<128x128xf32>, vector<128x128xf32>, vector<128x128xf32> -> vector<128x128xf32>
    %c0_9 = arith.constant 0 : index
    %c0_10 = arith.constant 0 : index
    %10 = vector.load %arg5[%c0_9, %c0_10] : memref<1x128xf32, #tpu.memory_space<vmem>>, vector<1x128xf32>
    %11 = vector.broadcast %10 : vector<1x128xf32> to vector<128x128xf32>
    %12 = arith.addf %9, %11 : vector<128x128xf32>
    %cst_11 = arith.constant 0.000000e+00 : f32
    %13 = vector.broadcast %cst_11 : f32 to vector<128x128xf32>
    %14 = arith.maximumf %12, %13 : vector<128x128xf32>
    %c0_12 = arith.constant 0 : index
    %c0_13 = arith.constant 0 : index
    %15 = vector.load %arg6[%c0_12, %c0_13] : memref<128x128xf32, #tpu.memory_space<vmem>>, vector<128x128xf32>
    %cst_14 = arith.constant dense<0.000000e+00> : vector<128x128xf32>
    %16 = tpu.matmul %14, %15, %cst_14 {dimension_numbers = #tpu.dot_dimension_numbers<[1], [0], [0], [1], [0, 0, 1, 1], [], []>} : vector<128x128xf32>, vector<128x128xf32>, vector<128x128xf32> -> vector<128x128xf32>
    %c0_15 = arith.constant 0 : index
    %c0_16 = arith.constant 0 : index
    %17 = vector.load %arg7[%c0_15, %c0_16] : memref<1x128xf32, #tpu.memory_space<vmem>>, vector<1x128xf32>
    %18 = vector.broadcast %17 : vector<1x128xf32> to vector<128x128xf32>
    %19 = arith.addf %16, %18 : vector<128x128xf32>
    %cst_17 = arith.constant dense<0xFF800000> : vector<128xf32>
    %20 = vector.multi_reduction <maximumf>, %19, %cst_17 [1] : vector<128x128xf32> to vector<128xf32>
    %21 = vector.shape_cast %20 : vector<128xf32> to vector<128x1xf32>
    %22 = vector.broadcast %21 : vector<128x1xf32> to vector<128x128xf32>
    %23 = arith.subf %19, %22 : vector<128x128xf32>
    %24 = math.exp %23 : vector<128x128xf32>
    %cst_18 = arith.constant dense<0.000000e+00> : vector<128xf32>
    %25 = vector.multi_reduction <add>, %24, %cst_18 [1] : vector<128x128xf32> to vector<128xf32>
    %26 = vector.shape_cast %25 : vector<128xf32> to vector<128x1xf32>
    %27 = tpu.reciprocal %26 {approx = true} : vector<128x1xf32> -> vector<128x1xf32>
    %28 = vector.broadcast %27 : vector<128x1xf32> to vector<128x128xf32>
    %29 = arith.mulf %24, %28 : vector<128x128xf32>
    %c0_19 = arith.constant 0 : index
    %c0_20 = arith.constant 0 : index
    %30 = vector.load %arg8[%c0_19, %c0_20] : memref<128x128xf32, #tpu.memory_space<vmem>>, vector<128x128xf32>
    tpu.vector_store %arg8[%c0_19, %c0_20], %29 {strides = array<i32>} : memref<128x128xf32, #tpu.memory_space<vmem>>, vector<128x128xf32>,
    return
  }
  func.func @transform_0(%arg0: i32) -> (i32, i32) {
    %c0_i32 = arith.constant 0 : i32
    %c0_i32_0 = arith.constant 0 : i32
    return %arg0, %c0_i32 : i32, i32
  }
  func.func @transform_1(%arg0: i32) -> (i32, i32) {
    %c0_i32 = arith.constant 0 : i32
    %c0_i32_0 = arith.constant 0 : i32
    %c0_i32_1 = arith.constant 0 : i32
    return %c0_i32, %c0_i32_0 : i32, i32
  }
  func.func @transform_2(%arg0: i32) -> (i32, i32) {
    %c0_i32 = arith.constant 0 : i32
    %c0_i32_0 = arith.constant 0 : i32
    %c0_i32_1 = arith.constant 0 : i32
    return %c0_i32, %c0_i32_0 : i32, i32
  }
  func.func @transform_3(%arg0: i32) -> (i32, i32) {
    %c0_i32 = arith.constant 0 : i32
    %c0_i32_0 = arith.constant 0 : i32
    %c0_i32_1 = arith.constant 0 : i32
    return %c0_i32, %c0_i32_0 : i32, i32
  }
  func.func @transform_4(%arg0: i32) -> (i32, i32) {
    %c0_i32 = arith.constant 0 : i32
    %c0_i32_0 = arith.constant 0 : i32
    %c0_i32_1 = arith.constant 0 : i32
    return %c0_i32, %c0_i32_0 : i32, i32
  }
  func.func @transform_5(%arg0: i32) -> (i32, i32) {
    %c0_i32 = arith.constant 0 : i32
    %c0_i32_0 = arith.constant 0 : i32
    %c0_i32_1 = arith.constant 0 : i32
    return %c0_i32, %c0_i32_0 : i32, i32
  }
  func.func @transform_6(%arg0: i32) -> (i32, i32) {
    %c0_i32 = arith.constant 0 : i32
    %c0_i32_0 = arith.constant 0 : i32
    %c0_i32_1 = arith.constant 0 : i32
    return %c0_i32, %c0_i32_0 : i32, i32
  }
  func.func @transform_7(%arg0: i32) -> (i32, i32) {
    %c0_i32 = arith.constant 0 : i32
    %c0_i32_0 = arith.constant 0 : i32
    return %arg0, %c0_i32 : i32, i32
  }
}

</mosaic_0001>

<bundles_post_ra>
// kernel: tpu_custom_call.1
= control target key start
LH: loop header
LB: loop body
LE: loop exit
PB: predicated region body
PF: predicated region fallthrough
CT: control target
= control target key end

     0   :  { %12 = vsyncpa [#allocation3], 0  ;;  %s1664_s0 = inlined_call_operand.hbm [shape: f32[128,128], index: 0, kind: input, shape index: {}]   ;;  %s1665_s1 = inlined_call_operand.hbm [shape: f32[128,128], index: 1, kind: input, shape index: {}]   ;;  %s1666_s2 = inlined_call_operand.vmem [shape: f32[1,128], index: 2, kind: input, shape index: {}]   ;;  %s1667_s3 = inlined_call_operand.hbm [shape: f32[128,128], index: 3, kind: input, shape index: {}]   ;;  %s1668_s4 = inlined_call_operand.vmem [shape: f32[1,128], index: 4, kind: input, shape index: {}]   ;;  %s1669_s5 = inlined_call_operand.hbm [shape: f32[128,128], index: 5, kind: input, shape index: {}]   ;;  %s1670_s6 = inlined_call_operand.vmem [shape: f32[1,128], index: 6, kind: input, shape index: {}]   ;;  %s1671_s7 = inlined_call_operand.hbm [shape: f32[128,128], index: 7, kind: output, shape index: {}]  }
   0x1   :  { %13 = vsyncpa [#allocation6], 0 }
   0x2   :  { %14 = vsyncpa [#allocation9], 0 }
   0x3   :  { %15 = vsyncpa [#allocation4], 0  ;;  %s1381_s24 = smov [#allocation5]   ;;  %s1382_s26 = smov [#allocation2]  }
   0x4   :  { %s33_s25 = sshll.u32 %s1381_s24, 4  ;;  %s21_s27 = sshll.u32 %s1382_s26, 4  ;;  %s34_s25 = int_to_ptr.vmem [resolvable:$true] %s33_s25  ;;  %s1428_s27 = int_to_ptr.vmem [resolvable:$true] %s21_s27 }
   0x5   :  { %s1263_s30 = scalar_lea.hbm %s1665_s1, 2048 }
   0x6   :  { %p1264_p0 = scmp.ne.s32.totalorder %s1665_s1, %s1263_s30  ;;  %p1267_p1 = scmp.lt.u32.totalorder %s1263_s30, %s1665_s1 }
   0x8   :  { %p1269_p2 = pnand %p1267_p1, %p1264_p0 }
   0xa   :  { %1272 = shalt.err (!%p1269_p2)
}
   0xb   :  { %s1273_s12 = scalar_lea.vmem %s34_s25, 2048  ;;  %p1278_p4 = scmp.lt.s32.totalorder %s34_s25, %s34_s25 }
   0xc   :  { %p1274_p3 = scmp.ne.s32.totalorder %s34_s25, %s1273_s12  ;;  %p1279_p5 = scmp.lt.s32.totalorder %s1273_s12, %s1273_s12 }
   0xe   :  { %p1280_p6 = por %p1279_p5, %p1278_p4 }
  0x10   :  { %p1281_p7 = pnand %p1280_p6, %p1274_p3 }
  0x12   :  { %1284 = shalt.err (!%p1281_p7)
}
  0x13   :  { %s1383_s13 = smov 128   ;;  %s1384_s14 = smov 8  }
  0x14   :  { %39 = dma.hbm_to_vmem [thread:$0]  %s1665_s1, 2048, %s34_s25, [#allocation6], %s1383_s13, %s1383_s13, %s1384_s14  }
  0x15   :  { %s1285_s19 = scalar_lea.hbm %s1664_s0, 2048 }
  0x16   :  { %p1286_p8 = scmp.ne.s32.totalorder %s1664_s0, %s1285_s19  ;;  %p1289_p9 = scmp.lt.u32.totalorder %s1285_s19, %s1664_s0 }
  0x18   :  { %p1291_p10 = pnand %p1289_p9, %p1286_p8 }
  0x1a   :  { %1294 = shalt.err (!%p1291_p10)
}
  0x1b   :  { %s1295_s24 = scalar_lea.vmem %s1428_s27, 2048  ;;  %p1300_p12 = scmp.lt.s32.totalorder %s1428_s27, %s1428_s27 }
  0x1c   :  { %p1296_p11 = scmp.ne.s32.totalorder %s1428_s27, %s1295_s24  ;;  %p1301_p13 = scmp.lt.s32.totalorder %s1295_s24, %s1295_s24 }
  0x1e   :  { %p1302_p0 = por %p1301_p13, %p1300_p12 }
  0x20   :  { %p1303_p1 = pnand %p1302_p0, %p1296_p11 }
  0x22   :  { %1306 = shalt.err (!%p1303_p1)
}
  0x23   :  { %27 = dma.hbm_to_vmem [thread:$0]  %s1664_s0, 2048, %s1428_s27, [#allocation3], %s1383_s13, %s1383_s13, %s1384_s14  }
  0x24   :  { %s1385_s26 = smov [#allocation7]   ;;  %s1386_s29 = smov [#allocation8]  }
  0x25   :  { %s47_s28 = sshll.u32 %s1385_s26, 4  ;;  %s61_s30 = sshll.u32 %s1386_s29, 4  ;;  %s48_s28 = int_to_ptr.vmem [resolvable:$true] %s47_s28  ;;  %s1465_s30 = int_to_ptr.vmem [resolvable:$true] %s61_s30 }
  0x26   :  { %s1307_s10 = scalar_lea.hbm %s1667_s3, 2048 }
  0x27   :  { %p1308_p2 = scmp.ne.s32.totalorder %s1667_s3, %s1307_s10  ;;  %p1311_p3 = scmp.lt.u32.totalorder %s1307_s10, %s1667_s3 }
  0x29   :  { %p1313_p4 = pnand %p1311_p3, %p1308_p2 }
  0x2b   :  { %1316 = shalt.err (!%p1313_p4)
}
  0x2c   :  { %s1317_s0 = scalar_lea.vmem %s48_s28, 2048  ;;  %p1322_p6 = scmp.lt.s32.totalorder %s48_s28, %s48_s28 }
  0x2d   :  { %p1318_p5 = scmp.ne.s32.totalorder %s48_s28, %s1317_s0  ;;  %p1323_p7 = scmp.lt.s32.totalorder %s1317_s0, %s1317_s0 }
  0x2f   :  { %p1324_p8 = por %p1323_p7, %p1322_p6 }
  0x31   :  { %p1325_p9 = pnand %p1324_p8, %p1318_p5 }
  0x33   :  { %1328 = shalt.err (!%p1325_p9)
}
  0x34   :  { %53 = dma.hbm_to_vmem [thread:$0]  %s1667_s3, 2048, %s48_s28, [#allocation6], %s1383_s13, %s1383_s13, %s1384_s14  }
  0x35   :  { %s1329_s20 = scalar_lea.hbm %s1669_s5, 2048 }
  0x36   :  { %p1330_p10 = scmp.ne.s32.totalorder %s1669_s5, %s1329_s20  ;;  %p1333_p11 = scmp.lt.u32.totalorder %s1329_s20, %s1669_s5 }
  0x38   :  { %p1335_p12 = pnand %p1333_p11, %p1330_p10 }
  0x3a   :  { %1338 = shalt.err (!%p1335_p12)
}
  0x3b   :  { %s1339_s1 = scalar_lea.vmem %s1465_s30, 2048  ;;  %p1344_p0 = scmp.lt.s32.totalorder %s1465_s30, %s1465_s30 }
  0x3c   :  { %p1340_p13 = scmp.ne.s32.totalorder %s1465_s30, %s1339_s1  ;;  %p1345_p1 = scmp.lt.s32.totalorder %s1339_s1, %s1339_s1 }
  0x3e   :  { %p1346_p2 = por %p1345_p1, %p1344_p0 }
  0x40   :  { %p1347_p3 = pnand %p1346_p2, %p1340_p13 }
  0x42   :  { %1350 = shalt.err (!%p1347_p3)
}
  0x43   :  { %67 = dma.hbm_to_vmem [thread:$0]  %s1669_s5, 2048, %s1465_s30, [#allocation9], %s1383_s13, %s1383_s13, %s1384_s14  }
  0x44   :  { %1373 = dma.done.wait [#allocation3], 2048  }
  0x45   :  { %1374 = vsyncadd [#allocation3], 4294965248 }
  0x46   :  { %1375 = dma.done.wait [#allocation6], 4096  }
  0x47   :  { %1376 = vsyncadd [#allocation6], 4294963200 }
  0x48   :  { %1377 = dma.done.wait [#allocation9], 2048  }
  0x49   :  { %1378 = vsyncadd [#allocation9], 4294965248  ;;  %v98_v0 = vld [vmem:[#allocation5] sm:$0xff]  ;;  %v99_v1 = vld [vmem:[#allocation5 + $0x8] sm:$0xff] }
  0x4a   :  { %v100_v2 = vld [vmem:[#allocation5 + $0x10] sm:$0xff]  ;;  %v1080_v3 = vpack.c.bf16 %v99_v1, %v98_v0  ;;  %v101_v4 = vld [vmem:[#allocation5 + $0x18] sm:$0xff]  ;;  %v102_v6 = vld [vmem:[#allocation5 + $0x20] sm:$0xff] }
  0x4b   :  { %v1084_v5 = vpack.c.bf16 %v101_v4, %v100_v2  ;;  %v103_v7 = vld [vmem:[#allocation5 + $0x28] sm:$0xff]  ;;  %v82_v9 = vld [vmem:[#allocation2] sm:$0xff]  ;;  %v104_v10 = vld [vmem:[#allocation5 + $0x30] sm:$0xff] }
  0x4c   :  { %1081 = vmatprep.subr.bf16.mxu0 %v1080_v3  ;;  %v1088_v8 = vpack.c.bf16 %v103_v7, %v102_v6  ;;  %v105_v11 = vld [vmem:[#allocation5 + $0x38] sm:$0xff]  ;;  %944 = vmatprep.mubr.f32.mxu0 %v82_v9  ;;  %v106_v13 = vld [vmem:[#allocation5 + $0x40] sm:$0xff]  ;;  %v107_v14 = vld [vmem:[#allocation5 + $0x48] sm:$0xff] }
  0x4d   :  { %1083 = vmatpush3.bf16.msra.mxu0 %v1080_v3  ;;  %v1092_v12 = vpack.c.bf16 %v105_v11, %v104_v10  ;;  %v282_v15 = vld [vmem:[#allocation7] sm:$0xff]  ;;  %v283_v16 = vld [vmem:[#allocation7 + $0x8] sm:$0xff]  ;;  %v284_v17 = vld [vmem:[#allocation7 + $0x10] sm:$0xff]  ;;  %v1096_v21 = vpack.c.bf16 %v107_v14, %v106_v13 }
  0x4e   :  { %1085 = vmatprep.subr.bf16.mxu0 %v1084_v5  ;;  %v285_v18 = vld [vmem:[#allocation7 + $0x18] sm:$0xff]  ;;  %v1112_v19 = vpack.c.bf16 %v283_v16, %v282_v15  ;;  %v286_v22 = vld [vmem:[#allocation7 + $0x20] sm:$0xff]  ;;  %v287_v23 = vld [vmem:[#allocation7 + $0x28] sm:$0xff] }
  0x4f   :  { %v1116_v20 = vpack.c.bf16 %v285_v18, %v284_v17  ;;  %v108_v24 = vld [vmem:[#allocation5 + $0x50] sm:$0xff]  ;;  %v109_v25 = vld [vmem:[#allocation5 + $0x58] sm:$0xff]  ;;  %v1120_v26 = vpack.c.bf16 %v287_v23, %v286_v22  ;;  %v110_v30 = vld [vmem:[#allocation5 + $0x60] sm:$0xff] }
  0x50   :  { %1113 = vmatprep.subr.bf16.mxu1 %v1112_v19  ;;  %v1100_v27 = vpack.c.bf16 %v109_v25, %v108_v24  ;;  %v288_v28 = vld [vmem:[#allocation7 + $0x30] sm:$0xff]  ;;  %v289_v29 = vld [vmem:[#allocation7 + $0x38] sm:$0xff]  ;;  %v111_v31 = vld [vmem:[#allocation5 + $0x68] sm:$0xff] }
  0x51   :  { %1087 = vmatpush3.bf16.msra.mxu0 %v1084_v5  ;;  %1115 = vmatpush3.bf16.msra.mxu1 %v1112_v19  ;;  %v1124_v32 = vpack.c.bf16 %v289_v29, %v288_v28  ;;  %v1104_v33 = vpack.c.bf16 %v111_v31, %v110_v30  ;;  %v290_v34 = vld [vmem:[#allocation7 + $0x40] sm:$0xff]  ;;  %v291_v35 = vld [vmem:[#allocation7 + $0x48] sm:$0xff]  ;;  %v112_v36 = vld [vmem:[#allocation5 + $0x70] sm:$0xff] }
  0x52   :  { %1089 = vmatprep.subr.bf16.mxu0 %v1088_v8  ;;  %1117 = vmatprep.subr.bf16.mxu1 %v1116_v20  ;;  %v113_v37 = vld [vmem:[#allocation5 + $0x78] sm:$0xff]  ;;  %v1128_v38 = vpack.c.bf16 %v291_v35, %v290_v34  ;;  %v292_v40 = vld [vmem:[#allocation7 + $0x50] sm:$0xff]  ;;  %v294_v43 = vld [vmem:[#allocation7 + $0x60] sm:$0xff] }
  0x53   :  { %v1108_v39 = vpack.c.bf16 %v113_v37, %v112_v36  ;;  %v293_v41 = vld [vmem:[#allocation7 + $0x58] sm:$0xff]  ;;  %v295_v44 = vld [vmem:[#allocation7 + $0x68] sm:$0xff]  ;;  %v84_v47 = vld [vmem:[#allocation2 + $0x10] sm:$0xff] }
  0x54   :  { %v1132_v42 = vpack.c.bf16 %v293_v41, %v292_v40  ;;  %v83_v45 = vld [vmem:[#allocation2 + $0x8] sm:$0xff]  ;;  %v1136_v46 = vpack.c.bf16 %v295_v44, %v294_v43  ;;  %v85_v48 = vld [vmem:[#allocation2 + $0x18] sm:$0xff]  ;;  %v86_v49 = vld [vmem:[#allocation2 + $0x20] sm:$0xff] }
  0x55   :  { %1091 = vmatpush3.bf16.msra.mxu0 %v1088_v8  ;;  %1119 = vmatpush3.bf16.msra.mxu1 %v1116_v20  ;;  %v87_v50 = vld [vmem:[#allocation2 + $0x28] sm:$0xff]  ;;  %v88_v51 = vld [vmem:[#allocation2 + $0x30] sm:$0xff]  ;;  %v89_v52 = vld [vmem:[#allocation2 + $0x38] sm:$0xff] }
  0x56   :  { %1093 = vmatprep.subr.bf16.mxu0 %v1092_v12  ;;  %1121 = vmatprep.subr.bf16.mxu1 %v1120_v26  ;;  %v90_v53 = vld [vmem:[#allocation2 + $0x40] sm:$0xff]  ;;  %v91_v54 = vld [vmem:[#allocation2 + $0x48] sm:$0xff]  ;;  %v92_v55 = vld [vmem:[#allocation2 + $0x50] sm:$0xff] }
  0x57   :  { %v93_v56 = vld [vmem:[#allocation2 + $0x58] sm:$0xff]  ;;  %v94_v57 = vld [vmem:[#allocation2 + $0x60] sm:$0xff]  ;;  %v95_v58 = vld [vmem:[#allocation2 + $0x68] sm:$0xff] }
  0x58   :  { %v96_v59 = vld [vmem:[#allocation2 + $0x70] sm:$0xff]  ;;  %v97_v60 = vld [vmem:[#allocation2 + $0x78] sm:$0xff]  ;;  %v466_v0 = vld [vmem:[#allocation8] sm:$0xff] }
  0x59   :  { %1095 = vmatpush3.bf16.msra.mxu0 %v1092_v12  ;;  %1123 = vmatpush3.bf16.msra.mxu1 %v1120_v26  ;;  %v296_v61 = vld [vmem:[#allocation7 + $0x70] sm:$0xff]  ;;  %v297_v62 = vld [vmem:[#allocation7 + $0x78] sm:$0xff]  ;;  %v467_v1 = vld [vmem:[#allocation8 + $0x8] sm:$0xff] }
  0x5a   :  { %1097 = vmatprep.subr.bf16.mxu0 %v1096_v21  ;;  %1125 = vmatprep.subr.bf16.mxu1 %v1124_v32  ;;  %v1140_v63 = vpack.c.bf16 %v297_v62, %v296_v61  ;;  %v468_v2 = vld [vmem:[#allocation8 + $0x10] sm:$0xff]  ;;  %v1144_v3 = vpack.c.bf16 %v467_v1, %v466_v0  ;;  %v469_v4 = vld [vmem:[#allocation8 + $0x18] sm:$0xff]  ;;  %v470_v6 = vld [vmem:[#allocation8 + $0x20] sm:$0xff] }
  0x5b   :  { %v1148_v5 = vpack.c.bf16 %v469_v4, %v468_v2  ;;  %v471_v7 = vld [vmem:[#allocation8 + $0x28] sm:$0xff]  ;;  %v472_v9 = vld [vmem:[#allocation8 + $0x30] sm:$0xff]  ;;  %v473_v10 = vld [vmem:[#allocation8 + $0x38] sm:$0xff] }
  0x5c   :  { %v1152_v8 = vpack.c.bf16 %v471_v7, %v470_v6  ;;  %v1502_v11 = vpack.c.bf16 %v473_v10, %v472_v9  ;;  %v474_v12 = vld [vmem:[#allocation8 + $0x40] sm:$0xff]  ;;  %v475_v13 = vld [vmem:[#allocation8 + $0x48] sm:$0xff]  ;;  %v476_v15 = vld [vmem:[#allocation8 + $0x50] sm:$0xff] }
  0x5d   :  { %1099 = vmatpush3.bf16.msra.mxu0 %v1096_v21  ;;  %1127 = vmatpush3.bf16.msra.mxu1 %v1124_v32  ;;  %v1505_v14 = vpack.c.bf16 %v475_v13, %v474_v12  ;;  %v477_v16 = vld [vmem:[#allocation8 + $0x58] sm:$0xff]  ;;  %v478_v18 = vld [vmem:[#allocation8 + $0x60] sm:$0xff]  ;;  %v479_v19 = vld [vmem:[#allocation8 + $0x68] sm:$0xff] }
  0x5e   :  { %1101 = vmatprep.subr.bf16.mxu0 %v1100_v27  ;;  %1129 = vmatprep.subr.bf16.mxu1 %v1128_v38  ;;  %v1509_v17 = vpack.c.bf16 %v477_v16, %v476_v15  ;;  %v1513_v20 = vpack.c.bf16 %v479_v19, %v478_v18  ;;  %v1521_v21 = vld [vmem:[%s1666_s2] ss:$0 sm:$0xff]  ;;  %v480_v6 = vld [vmem:[#allocation8 + $0x70] sm:$0xff]  ;;  %v481_v7 = vld [vmem:[#allocation8 + $0x78] sm:$0xff] }
  0x5f   :  { %v814_v9 = vld [vmem:[%s1668_s4] ss:$0 sm:$0xff] }
  0x61   :  { %1103 = vmatpush3.bf16.msra.mxu0 %v1100_v27  ;;  %1131 = vmatpush3.bf16.msra.mxu1 %v1128_v38 }
  0x62   :  { %1105 = vmatprep.subr.bf16.mxu0 %v1104_v33  ;;  %1133 = vmatprep.subr.bf16.mxu1 %v1132_v42 }
  0x65   :  { %1107 = vmatpush3.bf16.msra.mxu0 %v1104_v33  ;;  %1135 = vmatpush3.bf16.msra.mxu1 %v1132_v42 }
  0x66   :  { %1109 = vmatprep.subr.bf16.mxu0 %v1108_v39  ;;  %1137 = vmatprep.subr.bf16.mxu1 %v1136_v46 }
  0x69   :  { %1111 = vmatpush3.bf16.msra.mxu0 %v1108_v39  ;;  %1139 = vmatpush3.bf16.msra.mxu1 %v1136_v46 }
  0x6a   :  { %1141 = vmatprep.subr.bf16.mxu1 %v1140_v63  ;;  %1145 = vmatprep.subr.bf16.mxu0 %v1144_v3 }
  0x6c   :  { %945 = vmatmul.mubr.f32.vlgmr.msra.gmra.mrb[0].mxu0 %v83_v45 }
  0x6d   :  { %947 = vmatprep.mubr.f32.mxu0 %v84_v47  ;;  %1143 = vmatpush3.bf16.msra.mxu1 %v1140_v63 }
  0x6e   :  { %1176 = vmatprep.subr.bf16.mxu1 %v1144_v3  ;;  %1147 = vmatpush3.bf16.msra.mxu0 %v1144_v3 }
  0x6f   :  { %1149 = vmatprep.subr.bf16.mxu0 %v1148_v5 }
  0x70   :  { %948 = vmatmul.mubr.f32.gmra.mrb[2].mxu0 %v85_v48 }
  0x71   :  { %950 = vmatprep.mubr.f32.mxu0 %v86_v49 }
  0x72   :  { %1151 = vmatpush3.bf16.msra.mxu0 %v1148_v5 }
  0x73   :  { %1153 = vmatprep.subr.bf16.mxu0 %v1152_v8 }
  0x74   :  { %951 = vmatmul.mubr.f32.gmra.mrb[4].mxu0 %v87_v50 }
  0x75   :  { %953 = vmatprep.mubr.f32.mxu0 %v88_v51 }
  0x76   :  { %1155 = vmatpush3.bf16.msra.mxu0 %v1152_v8 }
  0x77   :  { %1157 = vmatprep.subr.bf16.mxu0 %v1502_v11 }
  0x78   :  { %954 = vmatmul.mubr.f32.gmra.mrb[6].mxu0 %v89_v52 }
  0x79   :  { %956 = vmatprep.mubr.f32.mxu0 %v90_v53 }
  0x7a   :  { %1159 = vmatpush3.bf16.msra.mxu0 %v1502_v11 }
  0x7b   :  { %1161 = vmatprep.subr.bf16.mxu0 %v1505_v14 }
  0x7c   :  { %957 = vmatmul.mubr.f32.gmra.mrb[8].mxu0 %v91_v54 }
  0x7d   :  { %959 = vmatprep.mubr.f32.mxu0 %v92_v55 }
  0x7e   :  { %1163 = vmatpush3.bf16.msra.mxu0 %v1505_v14 }
  0x7f   :  { %1165 = vmatprep.subr.bf16.mxu0 %v1509_v17 }
  0x80   :  { %960 = vmatmul.mubr.f32.gmra.mrb[10].mxu0 %v93_v56 }
  0x81   :  { %962 = vmatprep.mubr.f32.mxu0 %v94_v57 }
  0x82   :  { %1167 = vmatpush3.bf16.msra.mxu0 %v1509_v17 }
  0x83   :  { %1169 = vmatprep.subr.bf16.mxu0 %v1513_v20 }
  0x84   :  { %963 = vmatmul.mubr.f32.gmra.mrb[12].mxu0 %v95_v58 }
  0x85   :  { %965 = vmatprep.mubr.f32.mxu0 %v96_v59 }
  0x86   :  { %1171 = vmatpush3.bf16.msra.mxu0 %v1513_v20 }
  0x88   :  { %966 = vmatmul.mubr.f32.gmra.mrb[14].mxu0 %v97_v60 }
 0x13f   :  { %v946_v22 = vpop.f32.mrb[0].mxu0 }
 0x140   :  { %v193_v23 = vadd.f32 %v946_v22, %v1521_v21  ;;  %v187_v24 = vpop.f32.mrb[1].mxu0 }
 0x141   :  { %v188_v25 = vadd.f32 %v1521_v21, %v187_v24 }
 0x142   :  { %v267_v28 = vmax.f32 %v193_v23, 0.0 }
 0x143   :  { %v949_v26 = vpop.f32.mrb[2].mxu0  ;;  %v266_v27 = vmax.f32 %v188_v25, 0.0 }
 0x144   :  { %v203_v29 = vadd.f32 %v949_v26, %v1521_v21  ;;  %v197_v30 = vpop.f32.mrb[3].mxu0 }
 0x145   :  { %v198_v31 = vadd.f32 %v1521_v21, %v197_v30  ;;  %1000 = vmatprep.mubr.f32.mxu1 %v266_v27 }
 0x146   :  { %1001 = vmatmul.mubr.f32.vlgmr.msra.gmra.mrb[0].mxu1 %v267_v28  ;;  %v269_v34 = vmax.f32 %v203_v29, 0.0 }
 0x147   :  { %v268_v32 = vmax.f32 %v198_v31, 0.0  ;;  %v952_v33 = vpop.f32.mrb[4].mxu0  ;;  %1184 = vmatpush3.bf16.msra.mxu1 %v1144_v3 }
 0x148   :  { %v213_v35 = vadd.f32 %v952_v33, %v1521_v21  ;;  %v207_v36 = vpop.f32.mrb[5].mxu0  ;;  %1177 = vmatprep.subr.bf16.mxu1 %v1148_v5 }
 0x149   :  { %v208_v37 = vadd.f32 %v1521_v21, %v207_v36  ;;  %1003 = vmatprep.mubr.f32.mxu1 %v268_v32 }
 0x14a   :  { %v271_v38 = vmax.f32 %v213_v35, 0.0  ;;  %1004 = vmatmul.mubr.f32.gmra.mrb[2].mxu1 %v269_v34 }
 0x14b   :  { %v270_v39 = vmax.f32 %v208_v37, 0.0  ;;  %v955_v40 = vpop.f32.mrb[6].mxu0  ;;  %1185 = vmatpush3.bf16.msra.mxu1 %v1148_v5 }
 0x14c   :  { %v223_v41 = vadd.f32 %v955_v40, %v1521_v21  ;;  %v217_v42 = vpop.f32.mrb[7].mxu0  ;;  %1178 = vmatprep.subr.bf16.mxu1 %v1152_v8 }
 0x14d   :  { %v218_v43 = vadd.f32 %v1521_v21, %v217_v42  ;;  %1006 = vmatprep.mubr.f32.mxu1 %v270_v39 }
 0x14e   :  { %v273_v44 = vmax.f32 %v223_v41, 0.0  ;;  %1007 = vmatmul.mubr.f32.gmra.mrb[4].mxu1 %v271_v38 }
 0x14f   :  { %v272_v45 = vmax.f32 %v218_v43, 0.0  ;;  %v958_v46 = vpop.f32.mrb[8].mxu0  ;;  %1186 = vmatpush3.bf16.msra.mxu1 %v1152_v8  ;;  %v1172_v8 = vpack.c.bf16 %v481_v7, %v480_v6 }
 0x150   :  { %v233_v47 = vadd.f32 %v958_v46, %v1521_v21  ;;  %v227_v48 = vpop.f32.mrb[9].mxu0  ;;  %1179 = vmatprep.subr.bf16.mxu1 %v1502_v11 }
 0x151   :  { %v228_v49 = vadd.f32 %v1521_v21, %v227_v48  ;;  %1009 = vmatprep.mubr.f32.mxu1 %v272_v45  ;;  %1173 = vmatprep.subr.bf16.mxu0 %v1172_v8 }
 0x152   :  { %v275_v50 = vmax.f32 %v233_v47, 0.0  ;;  %1010 = vmatmul.mubr.f32.gmra.mrb[6].mxu1 %v273_v44  ;;  %1175 = vmatpush3.bf16.msra.mxu0 %v1172_v8 }
 0x153   :  { %v274_v51 = vmax.f32 %v228_v49, 0.0  ;;  %v961_v52 = vpop.f32.mrb[10].mxu0  ;;  %1187 = vmatpush3.bf16.msra.mxu1 %v1502_v11 }
 0x154   :  { %v243_v53 = vadd.f32 %v961_v52, %v1521_v21  ;;  %v237_v54 = vpop.f32.mrb[11].mxu0  ;;  %1180 = vmatprep.subr.bf16.mxu1 %v1505_v14 }
 0x155   :  { %v238_v55 = vadd.f32 %v1521_v21, %v237_v54  ;;  %1012 = vmatprep.mubr.f32.mxu1 %v274_v51 }
 0x156   :  { %v277_v56 = vmax.f32 %v243_v53, 0.0  ;;  %1013 = vmatmul.mubr.f32.gmra.mrb[8].mxu1 %v275_v50 }
 0x157   :  { %v276_v57 = vmax.f32 %v238_v55, 0.0  ;;  %v964_v58 = vpop.f32.mrb[12].mxu0  ;;  %1188 = vmatpush3.bf16.msra.mxu1 %v1505_v14 }
 0x158   :  { %v253_v59 = vadd.f32 %v964_v58, %v1521_v21  ;;  %v247_v60 = vpop.f32.mrb[13].mxu0  ;;  %1181 = vmatprep.subr.bf16.mxu1 %v1509_v17  ;;  %v815_v58 = vld [vmem:[%s1670_s6] ss:$0 sm:$0xff]  ;;  %s1387_s6 = smov [#allocation10]  }
 0x159   :  { %v248_v61 = vadd.f32 %v1521_v21, %v247_v60  ;;  %1015 = vmatprep.mubr.f32.mxu1 %v276_v57  ;;  %s799_s30 = sshll.u32 %s1387_s6, 4  ;;  %s800_s30 = int_to_ptr.vmem [resolvable:$true] %s799_s30 }
 0x15a   :  { %v279_v62 = vmax.f32 %v253_v59, 0.0  ;;  %1016 = vmatmul.mubr.f32.gmra.mrb[10].mxu1 %v277_v56  ;;  %s1351_s8 = scalar_lea.vmem %s800_s30, 2048  ;;  %p1356_p5 = scmp.lt.s32.totalorder %s800_s30, %s800_s30 }
 0x15b   :  { %v278_v63 = vmax.f32 %v248_v61, 0.0  ;;  %v967_v0 = vpop.f32.mrb[14].mxu0  ;;  %1189 = vmatpush3.bf16.msra.mxu1 %v1509_v17  ;;  %p1352_p4 = scmp.ne.s32.totalorder %s800_s30, %s1351_s8  ;;  %p1357_p6 = scmp.lt.s32.totalorder %s1351_s8, %s1351_s8 }
 0x15c   :  { %v263_v1 = vadd.f32 %v967_v0, %v1521_v21  ;;  %v257_v2 = vpop.f32.mrb[15].mxu0  ;;  %1182 = vmatprep.subr.bf16.mxu1 %v1513_v20 }
 0x15d   :  { %v258_v3 = vadd.f32 %v1521_v21, %v257_v2  ;;  %1018 = vmatprep.mubr.f32.mxu1 %v278_v63  ;;  %p1358_p7 = por %p1357_p6, %p1356_p5 }
 0x15e   :  { %v281_v4 = vmax.f32 %v263_v1, 0.0  ;;  %1019 = vmatmul.mubr.f32.gmra.mrb[12].mxu1 %v279_v62 }
 0x15f   :  { %v280_v5 = vmax.f32 %v258_v3, 0.0  ;;  %1190 = vmatpush3.bf16.msra.mxu1 %v1513_v20  ;;  %p1359_p8 = pnand %p1358_p7, %p1352_p4 }
 0x160   :  { %1183 = vmatprep.subr.bf16.mxu1 %v1172_v8 }
 0x161   :  { %1021 = vmatprep.mubr.f32.mxu1 %v280_v5 }
 0x162   :  { %1022 = vmatmul.mubr.f32.gmra.mrb[14].mxu1 %v281_v4 }
 0x163   :  { %1191 = vmatpush3.bf16.msra.mxu1 %v1172_v8 }
 0x219   :  { %v1002_v10 = vpop.f32.mrb[0].mxu1 }
 0x21a   :  { %v377_v11 = vadd.f32 %v1002_v10, %v814_v9  ;;  %v371_v12 = vpop.f32.mrb[1].mxu1 }
 0x21b   :  { %v372_v13 = vadd.f32 %v814_v9, %v371_v12 }
 0x21c   :  { %v451_v16 = vmax.f32 %v377_v11, 0.0 }
 0x21d   :  { %v450_v14 = vmax.f32 %v372_v13, 0.0  ;;  %v1005_v15 = vpop.f32.mrb[2].mxu1 }
 0x21e   :  { %v387_v17 = vadd.f32 %v1005_v15, %v814_v9  ;;  %v381_v18 = vpop.f32.mrb[3].mxu1 }
 0x21f   :  { %v382_v19 = vadd.f32 %v814_v9, %v381_v18  ;;  %1056 = vmatprep.mubr.f32.mxu0 %v450_v14 }
 0x220   :  { %1057 = vmatmul.mubr.f32.vlgmr.msra.gmra.mrb[16].mxu0 %v451_v16  ;;  %v453_v22 = vmax.f32 %v387_v17, 0.0 }
 0x221   :  { %v452_v20 = vmax.f32 %v382_v19, 0.0  ;;  %v1008_v21 = vpop.f32.mrb[4].mxu1 }
 0x222   :  { %v397_v23 = vadd.f32 %v1008_v21, %v814_v9  ;;  %v391_v24 = vpop.f32.mrb[5].mxu1 }
 0x223   :  { %v392_v25 = vadd.f32 %v814_v9, %v391_v24  ;;  %1059 = vmatprep.mubr.f32.mxu0 %v452_v20 }
 0x224   :  { %v455_v26 = vmax.f32 %v397_v23, 0.0  ;;  %1060 = vmatmul.mubr.f32.gmra.mrb[18].mxu0 %v453_v22 }
 0x225   :  { %v454_v27 = vmax.f32 %v392_v25, 0.0  ;;  %v1011_v28 = vpop.f32.mrb[6].mxu1 }
 0x226   :  { %v407_v29 = vadd.f32 %v1011_v28, %v814_v9  ;;  %v401_v30 = vpop.f32.mrb[7].mxu1 }
 0x227   :  { %v402_v31 = vadd.f32 %v814_v9, %v401_v30  ;;  %1062 = vmatprep.mubr.f32.mxu0 %v454_v27 }
 0x228   :  { %v457_v32 = vmax.f32 %v407_v29, 0.0  ;;  %1063 = vmatmul.mubr.f32.gmra.mrb[20].mxu0 %v455_v26 }
 0x229   :  { %v456_v33 = vmax.f32 %v402_v31, 0.0  ;;  %v1014_v34 = vpop.f32.mrb[8].mxu1 }
 0x22a   :  { %v417_v35 = vadd.f32 %v1014_v34, %v814_v9  ;;  %v411_v36 = vpop.f32.mrb[9].mxu1 }
 0x22b   :  { %v412_v37 = vadd.f32 %v814_v9, %v411_v36  ;;  %1065 = vmatprep.mubr.f32.mxu0 %v456_v33 }
 0x22c   :  { %v459_v38 = vmax.f32 %v417_v35, 0.0  ;;  %1066 = vmatmul.mubr.f32.gmra.mrb[22].mxu0 %v457_v32 }
 0x22d   :  { %v458_v39 = vmax.f32 %v412_v37, 0.0  ;;  %v1017_v40 = vpop.f32.mrb[10].mxu1 }
 0x22e   :  { %v427_v41 = vadd.f32 %v1017_v40, %v814_v9  ;;  %v421_v42 = vpop.f32.mrb[11].mxu1 }
 0x22f   :  { %v422_v43 = vadd.f32 %v814_v9, %v421_v42  ;;  %1068 = vmatprep.mubr.f32.mxu1 %v458_v39 }
 0x230   :  { %v461_v44 = vmax.f32 %v427_v41, 0.0  ;;  %1069 = vmatmul.mubr.f32.vlgmr.msra.gmra.mrb[16].mxu1 %v459_v38 }
 0x231   :  { %v460_v45 = vmax.f32 %v422_v43, 0.0  ;;  %v1020_v46 = vpop.f32.mrb[12].mxu1 }
 0x232   :  { %v437_v47 = vadd.f32 %v1020_v46, %v814_v9  ;;  %v431_v48 = vpop.f32.mrb[13].mxu1 }
 0x233   :  { %v432_v49 = vadd.f32 %v814_v9, %v431_v48  ;;  %1071 = vmatprep.mubr.f32.mxu1 %v460_v45 }
 0x234   :  { %v463_v50 = vmax.f32 %v437_v47, 0.0  ;;  %1072 = vmatmul.mubr.f32.gmra.mrb[18].mxu1 %v461_v44 }
 0x235   :  { %v462_v51 = vmax.f32 %v432_v49, 0.0  ;;  %v1023_v52 = vpop.f32.mrb[14].mxu1 }
 0x236   :  { %v447_v53 = vadd.f32 %v1023_v52, %v814_v9  ;;  %v441_v54 = vpop.f32.mrb[15].mxu1 }
 0x237   :  { %v442_v55 = vadd.f32 %v814_v9, %v441_v54  ;;  %1074 = vmatprep.mubr.f32.mxu1 %v462_v51 }
 0x238   :  { %v465_v56 = vmax.f32 %v447_v53, 0.0  ;;  %1075 = vmatmul.mubr.f32.gmra.mrb[20].mxu1 %v463_v50 }
 0x239   :  { %v464_v57 = vmax.f32 %v442_v55, 0.0 }
 0x23b   :  { %1077 = vmatprep.mubr.f32.mxu1 %v464_v57 }
 0x23c   :  { %1078 = vmatmul.mubr.f32.gmra.mrb[22].mxu1 %v465_v56 }
 0x2f3   :  { %v1058_v59 = vpop.f32.mrb[16].mxu0 }
 0x2f4   :  { %v561_v60 = vadd.f32 %v1058_v59, %v815_v58  ;;  %v555_v61 = vpop.f32.mrb[17].mxu0 }
 0x2f5   :  { %v556_v63 = vadd.f32 %v815_v58, %v555_v61 }
 0x2f6   :  { %636 = vmax.xlane.f32.xlu0 %v561_v60 }
 0x2f7   :  { %v1061_v62 = vpop.f32.mrb[18].mxu0 }
 0x2f8   :  { %v571_v0 = vadd.f32 %v1061_v62, %v815_v58  ;;  %v565_v1 = vpop.f32.mrb[19].mxu0 }
 0x2f9   :  { %v566_v3 = vadd.f32 %v815_v58, %v565_v1 }
 0x2fa   :  { %640 = vmax.xlane.f32.xlu1 %v571_v0  ;;  %634 = vmax.xlane.f32.xlu0 %v556_v63 }
 0x2fb   :  { %v1064_v2 = vpop.f32.mrb[20].mxu0 }
 0x2fc   :  { %v575_v4 = vpop.f32.mrb[21].mxu0  ;;  %v581_v7 = vadd.f32 %v1064_v2, %v815_v58 }
 0x2fd   :  { %v576_v5 = vadd.f32 %v815_v58, %v575_v4 }
 0x2fe   :  { %638 = vmax.xlane.f32.xlu1 %v566_v3 }
 0x2ff   :  { %v1067_v6 = vpop.f32.mrb[22].mxu0  ;;  %642 = vmax.xlane.f32.xlu0 %v576_v5 }
 0x300   :  { %v585_v8 = vpop.f32.mrb[23].mxu0  ;;  %v591_v11 = vadd.f32 %v1067_v6, %v815_v58 }
 0x301   :  { %v586_v9 = vadd.f32 %v815_v58, %v585_v8 }
 0x302   :  { %644 = vmax.xlane.f32.xlu1 %v581_v7 }
 0x303   :  { %v1070_v10 = vpop.f32.mrb[16].mxu1  ;;  %646 = vmax.xlane.f32.xlu0 %v586_v9 }
 0x304   :  { %v595_v12 = vpop.f32.mrb[17].mxu1  ;;  %v1556_v15 = vadd.f32 %v1070_v10, %v815_v58 }
 0x305   :  { %v1553_v13 = vadd.f32 %v815_v58, %v595_v12 }
 0x306   :  { %648 = vmax.xlane.f32.xlu1 %v591_v11 }
 0x307   :  { %v1073_v14 = vpop.f32.mrb[18].mxu1  ;;  %650 = vmax.xlane.f32.xlu0 %v1553_v13 }
 0x308   :  { %v605_v16 = vpop.f32.mrb[19].mxu1  ;;  %v1562_v19 = vadd.f32 %v1073_v14, %v815_v58 }
 0x309   :  { %v1558_v17 = vadd.f32 %v815_v58, %v605_v16 }
 0x30a   :  { %652 = vmax.xlane.f32.xlu1 %v1556_v15 }
 0x30b   :  { %v1076_v18 = vpop.f32.mrb[20].mxu1  ;;  %654 = vmax.xlane.f32.xlu0 %v1558_v17 }
 0x30c   :  { %v615_v20 = vpop.f32.mrb[21].mxu1  ;;  %v1568_v23 = vadd.f32 %v1076_v18, %v815_v58 }
 0x30d   :  { %v1564_v21 = vadd.f32 %v815_v58, %v615_v20 }
 0x30e   :  { %656 = vmax.xlane.f32.xlu1 %v1562_v19 }
 0x30f   :  { %v1079_v22 = vpop.f32.mrb[22].mxu1  ;;  %658 = vmax.xlane.f32.xlu0 %v1564_v21 }
 0x310   :  { %v625_v24 = vpop.f32.mrb[23].mxu1  ;;  %v1574_v26 = vadd.f32 %v1079_v22, %v815_v58 }
 0x311   :  { %v1570_v25 = vadd.f32 %v815_v58, %v625_v24 }
 0x312   :  { %660 = vmax.xlane.f32.xlu1 %v1568_v23 }
 0x313   :  { %662 = vmax.xlane.f32.xlu0 %v1570_v25 }
 0x316   :  { %664 = vmax.xlane.f32.xlu1 %v1574_v26 }
 0x383   :  { %v637_v27 = vpop.xlane.xlu0 %636 }
 0x384   :  { %v667_v28 = vsub.f32 %v561_v60, %v637_v27 }
 0x386   :  { %v684_v29 = vmul.f32 1.442695, %v667_v28 }
 0x387   :  { %v641_v30 = vpop.xlane.xlu1 %640  ;;  %v635_v31 = vpop.xlane.xlu0 %634 }
 0x388   :  { %1199 = vpow2.f32 %v684_v29  ;;  %v669_v32 = vsub.f32 %v571_v0, %v641_v30  ;;  %v666_v33 = vsub.f32 %v556_v63, %v635_v31 }
 0x38a   :  { %v688_v34 = vmul.f32 1.442695, %v669_v32  ;;  %v682_v35 = vmul.f32 1.442695, %v666_v33 }
 0x38b   :  { %v639_v36 = vpop.xlane.xlu1 %638 }
 0x38c   :  { %1201 = vpow2.f32 %v688_v34  ;;  %v668_v37 = vsub.f32 %v566_v3, %v639_v36  ;;  %v643_v38 = vpop.xlane.xlu0 %642 }
 0x38d   :  { %1203 = vpow2.f32 %v682_v35  ;;  %v670_v39 = vsub.f32 %v576_v5, %v643_v38 }
 0x38e   :  { %v686_v40 = vmul.f32 1.442695, %v668_v37 }
 0x38f   :  { %v645_v41 = vpop.xlane.xlu1 %644  ;;  %v690_v44 = vmul.f32 1.442695, %v670_v39 }
 0x390   :  { %1205 = vpow2.f32 %v686_v40  ;;  %v671_v42 = vsub.f32 %v581_v7, %v645_v41  ;;  %v647_v43 = vpop.xlane.xlu0 %646 }
 0x391   :  { %v672_v45 = vsub.f32 %v586_v9, %v647_v43 }
 0x392   :  { %v1577_v46 = vpop.eup %1199  ;;  %v692_v47 = vmul.f32 1.442695, %v671_v42 }
 0x393   :  { %716 = vadd.xlane.f32.xlu1 %v1577_v46  ;;  %v649_v48 = vpop.xlane.xlu1 %648  ;;  %v694_v51 = vmul.f32 1.442695, %v672_v45 }
 0x394   :  { %1207 = vpow2.f32 %v692_v47  ;;  %v673_v49 = vsub.f32 %v591_v11, %v649_v48  ;;  %v651_v50 = vpop.xlane.xlu0 %650 }
 0x395   :  { %1209 = vpow2.f32 %v690_v44  ;;  %v674_v52 = vsub.f32 %v1553_v13, %v651_v50 }
 0x396   :  { %v1581_v53 = vpop.eup %1201  ;;  %v696_v54 = vmul.f32 1.442695, %v673_v49 }
 0x397   :  { %v1583_v55 = vpop.eup %1203  ;;  %720 = vadd.xlane.f32.xlu1 %v1581_v53  ;;  %v653_v56 = vpop.xlane.xlu1 %652  ;;  %v698_v59 = vmul.f32 1.442695, %v674_v52 }
 0x398   :  { %1211 = vpow2.f32 %v696_v54  ;;  %v675_v57 = vsub.f32 %v1556_v15, %v653_v56  ;;  %714 = vadd.xlane.f32.xlu0 %v1583_v55  ;;  %v655_v58 = vpop.xlane.xlu0 %654 }
 0x399   :  { %1213 = vpow2.f32 %v694_v51  ;;  %v676_v60 = vsub.f32 %v1558_v17, %v655_v58 }
 0x39a   :  { %v1589_v61 = vpop.eup %1205  ;;  %v700_v62 = vmul.f32 1.442695, %v675_v57 }
 0x39b   :  { %v657_v63 = vpop.xlane.xlu1 %656  ;;  %v702_v2 = vmul.f32 1.442695, %v676_v60 }
 0x39c   :  { %1215 = vpow2.f32 %v700_v62  ;;  %v677_v0 = vsub.f32 %v1562_v19, %v657_v63  ;;  %718 = vadd.xlane.f32.xlu0 %v1589_v61  ;;  %v659_v1 = vpop.xlane.xlu0 %658 }
 0x39d   :  { %1217 = vpow2.f32 %v698_v59  ;;  %v678_v3 = vsub.f32 %v1564_v21, %v659_v1 }
 0x39e   :  { %v1594_v4 = vpop.eup %1207  ;;  %v704_v5 = vmul.f32 1.442695, %v677_v0 }
 0x39f   :  { %v1596_v6 = vpop.eup %1209  ;;  %724 = vadd.xlane.f32.xlu1 %v1594_v4  ;;  %v661_v7 = vpop.xlane.xlu1 %660  ;;  %v706_v10 = vmul.f32 1.442695, %v678_v3 }
 0x3a0   :  { %1219 = vpow2.f32 %v704_v5  ;;  %v679_v8 = vsub.f32 %v1568_v23, %v661_v7  ;;  %722 = vadd.xlane.f32.xlu0 %v1596_v6  ;;  %v663_v9 = vpop.xlane.xlu0 %662 }
 0x3a1   :  { %1221 = vpow2.f32 %v702_v2  ;;  %v680_v11 = vsub.f32 %v1570_v25, %v663_v9 }
 0x3a2   :  { %v1602_v12 = vpop.eup %1211  ;;  %v708_v13 = vmul.f32 1.442695, %v679_v8 }
 0x3a3   :  { %v1604_v14 = vpop.eup %1213  ;;  %728 = vadd.xlane.f32.xlu1 %v1602_v12  ;;  %v665_v15 = vpop.xlane.xlu1 %664  ;;  %v710_v17 = vmul.f32 1.442695, %v680_v11 }
 0x3a4   :  { %1223 = vpow2.f32 %v708_v13  ;;  %v681_v16 = vsub.f32 %v1574_v26, %v665_v15  ;;  %726 = vadd.xlane.f32.xlu0 %v1604_v14 }
 0x3a5   :  { %1225 = vpow2.f32 %v706_v10 }
 0x3a6   :  { %v1609_v18 = vpop.eup %1215  ;;  %v712_v19 = vmul.f32 1.442695, %v681_v16 }
 0x3a7   :  { %v1611_v20 = vpop.eup %1217  ;;  %732 = vadd.xlane.f32.xlu1 %v1609_v18 }
 0x3a8   :  { %1227 = vpow2.f32 %v712_v19  ;;  %730 = vadd.xlane.f32.xlu0 %v1611_v20 }
 0x3a9   :  { %1229 = vpow2.f32 %v710_v17 }
 0x3aa   :  { %v1615_v21 = vpop.eup %1219 }
 0x3ab   :  { %v1617_v22 = vpop.eup %1221  ;;  %736 = vadd.xlane.f32.xlu1 %v1615_v21 }
 0x3ac   :  { %734 = vadd.xlane.f32.xlu0 %v1617_v22 }
 0x3ae   :  { %v1621_v23 = vpop.eup %1223 }
 0x3af   :  { %v1623_v24 = vpop.eup %1225  ;;  %740 = vadd.xlane.f32.xlu1 %v1621_v23 }
 0x3b0   :  { %738 = vadd.xlane.f32.xlu0 %v1623_v24 }
 0x3b2   :  { %v1627_v25 = vpop.eup %1227 }
 0x3b3   :  { %v1629_v26 = vpop.eup %1229  ;;  %744 = vadd.xlane.f32.xlu1 %v1627_v25 }
 0x3b4   :  { %742 = vadd.xlane.f32.xlu0 %v1629_v26 }
 0x420   :  { %v717_v27 = vpop.xlane.xlu1 %716 }
 0x421   :  { %1231 = vrcp.f32 %v717_v27 }
 0x424   :  { %v721_v28 = vpop.xlane.xlu1 %720 }
 0x425   :  { %1233 = vrcp.f32 %v721_v28  ;;  %v715_v29 = vpop.xlane.xlu0 %714 }
 0x426   :  { %1235 = vrcp.f32 %v715_v29 }
 0x429   :  { %v719_v30 = vpop.xlane.xlu0 %718 }
 0x42a   :  { %1237 = vrcp.f32 %v719_v30 }
 0x42b   :  { %v1232_v31 = vpop.eup %1231 }
 0x42c   :  { %v763_v32 = vmul.f32 %v1232_v31, %v1577_v46  ;;  %v725_v33 = vpop.xlane.xlu1 %724 }
 0x42d   :  { %1239 = vrcp.f32 %v725_v33  ;;  %v723_v34 = vpop.xlane.xlu0 %722 }
 0x42e   :  { %779 = vst [vmem:[#allocation10 + $0x8] sm:$0xff] %v763_v32  ;;  %1241 = vrcp.f32 %v723_v34 }
 0x42f   :  { %v1234_v35 = vpop.eup %1233 }
 0x430   :  { %v1236_v36 = vpop.eup %1235  ;;  %v765_v37 = vmul.f32 %v1234_v35, %v1581_v53  ;;  %v729_v38 = vpop.xlane.xlu1 %728 }
 0x431   :  { %v762_v39 = vmul.f32 %v1236_v36, %v1583_v55  ;;  %1243 = vrcp.f32 %v729_v38  ;;  %v727_v40 = vpop.xlane.xlu0 %726 }
 0x432   :  { %781 = vst [vmem:[#allocation10 + $0x18] sm:$0xff] %v765_v37  ;;  %1245 = vrcp.f32 %v727_v40 }
 0x433   :  { %778 = vst [vmem:[#allocation10] sm:$0xff] %v762_v39 }
 0x434   :  { %v1238_v41 = vpop.eup %1237  ;;  %v733_v42 = vpop.xlane.xlu1 %732 }
 0x435   :  { %v764_v43 = vmul.f32 %v1238_v41, %v1589_v61  ;;  %1247 = vrcp.f32 %v733_v42  ;;  %v731_v44 = vpop.xlane.xlu0 %730 }
 0x436   :  { %1249 = vrcp.f32 %v731_v44 }
 0x437   :  { %v1240_v45 = vpop.eup %1239  ;;  %780 = vst [vmem:[#allocation10 + $0x10] sm:$0xff] %v764_v43 }
 0x438   :  { %v1242_v46 = vpop.eup %1241  ;;  %v767_v47 = vmul.f32 %v1240_v45, %v1594_v4  ;;  %v737_v48 = vpop.xlane.xlu1 %736 }
 0x439   :  { %v766_v49 = vmul.f32 %v1242_v46, %v1596_v6  ;;  %1251 = vrcp.f32 %v737_v48  ;;  %v735_v50 = vpop.xlane.xlu0 %734 }
 0x43a   :  { %783 = vst [vmem:[#allocation10 + $0x28] sm:$0xff] %v767_v47  ;;  %1253 = vrcp.f32 %v735_v50 }
 0x43b   :  { %v1244_v51 = vpop.eup %1243  ;;  %782 = vst [vmem:[#allocation10 + $0x20] sm:$0xff] %v766_v49 }
 0x43c   :  { %v1246_v52 = vpop.eup %1245  ;;  %v769_v53 = vmul.f32 %v1244_v51, %v1602_v12  ;;  %v741_v54 = vpop.xlane.xlu1 %740 }
 0x43d   :  { %v768_v55 = vmul.f32 %v1246_v52, %v1604_v14  ;;  %1255 = vrcp.f32 %v741_v54  ;;  %v739_v56 = vpop.xlane.xlu0 %738 }
 0x43e   :  { %785 = vst [vmem:[#allocation10 + $0x38] sm:$0xff] %v769_v53  ;;  %1257 = vrcp.f32 %v739_v56 }
 0x43f   :  { %v1248_v57 = vpop.eup %1247  ;;  %784 = vst [vmem:[#allocation10 + $0x30] sm:$0xff] %v768_v55 }
 0x440   :  { %v1250_v58 = vpop.eup %1249  ;;  %v771_v59 = vmul.f32 %v1248_v57, %v1609_v18  ;;  %v745_v60 = vpop.xlane.xlu1 %744 }
 0x441   :  { %v770_v61 = vmul.f32 %v1250_v58, %v1611_v20  ;;  %1259 = vrcp.f32 %v745_v60  ;;  %v743_v62 = vpop.xlane.xlu0 %742 }
 0x442   :  { %787 = vst [vmem:[#allocation10 + $0x48] sm:$0xff] %v771_v59  ;;  %1261 = vrcp.f32 %v743_v62 }
 0x443   :  { %v1252_v63 = vpop.eup %1251  ;;  %786 = vst [vmem:[#allocation10 + $0x40] sm:$0xff] %v770_v61 }
 0x444   :  { %v1254_v0 = vpop.eup %1253  ;;  %v773_v1 = vmul.f32 %v1252_v63, %v1615_v21 }
 0x445   :  { %v772_v2 = vmul.f32 %v1254_v0, %v1617_v22 }
 0x446   :  { %789 = vst [vmem:[#allocation10 + $0x58] sm:$0xff] %v773_v1 }
 0x447   :  { %v1256_v3 = vpop.eup %1255  ;;  %788 = vst [vmem:[#allocation10 + $0x50] sm:$0xff] %v772_v2 }
 0x448   :  { %v1258_v4 = vpop.eup %1257  ;;  %v775_v5 = vmul.f32 %v1256_v3, %v1621_v23 }
 0x449   :  { %v774_v6 = vmul.f32 %v1258_v4, %v1623_v24 }
 0x44a   :  { %791 = vst [vmem:[#allocation10 + $0x68] sm:$0xff] %v775_v5 }
 0x44b   :  { %v1260_v7 = vpop.eup %1259  ;;  %790 = vst [vmem:[#allocation10 + $0x60] sm:$0xff] %v774_v6 }
 0x44c   :  { %v1262_v8 = vpop.eup %1261  ;;  %v777_v9 = vmul.f32 %v1260_v7, %v1627_v25 }
 0x44d   :  { %v776_v10 = vmul.f32 %v1262_v8, %v1629_v26 }
 0x44e   :  { %793 = vst [vmem:[#allocation10 + $0x78] sm:$0xff] %v777_v9 }
 0x44f   :  { %792 = vst [vmem:[#allocation10 + $0x70] sm:$0xff] %v776_v10 }
 0x450   :  { %1362 = shalt.err (!%p1359_p8)
}
 0x451   :  { %s1363_s11 = scalar_lea.hbm %s1671_s7, 2048 }
 0x452   :  { %p1364_p9 = scmp.ne.s32.totalorder %s1671_s7, %s1363_s11  ;;  %p1367_p10 = scmp.lt.u32.totalorder %s1363_s11, %s1671_s7 }
 0x454   :  { %p1369_p11 = pnand %p1367_p10, %p1364_p9 }
 0x456   :  { %1372 = shalt.err (!%p1369_p11)
}
 0x457   :  { %805 = dma.vmem_to_hbm [thread:$0]  %s800_s30, 2048, %s1671_s7, [#allocation4], %s1383_s13, %s1383_s13, %s1384_s14  }
 0x458   :  { %1379 = dma.done.wait [#allocation4], 2048  }
 0x459   :  { %1380 = vsyncadd [#allocation4], 4294965248 }
 0x45a   :  { %809 = vsyncpa [#allocation3], 1 }
 0x45b   :  { %810 = vsyncpa [#allocation6], 1 }
 0x45c   :  { %811 = vsyncpa [#allocation9], 1 }
 0x45d   :  { %812 = vsyncpa [#allocation4], 1 }

// kernel: tpu_custom_call.1
= control target key start
LH: loop header
LB: loop body
LE: loop exit
PB: predicated region body
PF: predicated region fallthrough
CT: control target
= control target key end

     0   :  { %12 = vsyncpa [#allocation3], 0  ;;  %s1664_s0 = inlined_call_operand.hbm [shape: f32[128,128], index: 0, kind: input, shape index: {}]   ;;  %s1665_s1 = inlined_call_operand.hbm [shape: f32[128,128], index: 1, kind: input, shape index: {}]   ;;  %s1666_s2 = inlined_call_operand.vmem [shape: f32[1,128], index: 2, kind: input, shape index: {}]   ;;  %s1667_s3 = inlined_call_operand.hbm [shape: f32[128,128], index: 3, kind: input, shape index: {}]   ;;  %s1668_s4 = inlined_call_operand.vmem [shape: f32[1,128], index: 4, kind: input, shape index: {}]   ;;  %s1669_s5 = inlined_call_operand.hbm [shape: f32[128,128], index: 5, kind: input, shape index: {}]   ;;  %s1670_s6 = inlined_call_operand.vmem [shape: f32[1,128], index: 6, kind: input, shape index: {}]   ;;  %s1671_s7 = inlined_call_operand.hbm [shape: f32[128,128], index: 7, kind: output, shape index: {}]  }
   0x1   :  { %13 = vsyncpa [#allocation6], 0 }
   0x2   :  { %14 = vsyncpa [#allocation9], 0 }
   0x3   :  { %15 = vsyncpa [#allocation4], 0  ;;  %s1381_s24 = smov [#allocation5]   ;;  %s1382_s26 = smov [#allocation2]  }
   0x4   :  { %s33_s25 = sshll.u32 %s1381_s24, 4  ;;  %s21_s27 = sshll.u32 %s1382_s26, 4  ;;  %s34_s25 = int_to_ptr.vmem [resolvable:$true] %s33_s25  ;;  %s1428_s27 = int_to_ptr.vmem [resolvable:$true] %s21_s27 }
   0x5   :  { %s1263_s30 = scalar_lea.hbm %s1665_s1, 2048 }
   0x6   :  { %p1264_p0 = scmp.ne.s32.totalorder %s1665_s1, %s1263_s30  ;;  %p1267_p1 = scmp.lt.u32.totalorder %s1263_s30, %s1665_s1 }
   0x8   :  { %p1269_p2 = pnand %p1267_p1, %p1264_p0 }
   0xa   :  { %1272 = shalt.err (!%p1269_p2)
}
   0xb   :  { %s1273_s12 = scalar_lea.vmem %s34_s25, 2048  ;;  %p1278_p4 = scmp.lt.s32.totalorder %s34_s25, %s34_s25 }
   0xc   :  { %p1274_p3 = scmp.ne.s32.totalorder %s34_s25, %s1273_s12  ;;  %p1279_p5 = scmp.lt.s32.totalorder %s1273_s12, %s1273_s12 }
   0xe   :  { %p1280_p6 = por %p1279_p5, %p1278_p4 }
  0x10   :  { %p1281_p7 = pnand %p1280_p6, %p1274_p3 }
  0x12   :  { %1284 = shalt.err (!%p1281_p7)
}
  0x13   :  { %s1383_s13 = smov 128   ;;  %s1384_s14 = smov 8  }
  0x14   :  { %39 = dma.hbm_to_vmem [thread:$0]  %s1665_s1, 2048, %s34_s25, [#allocation6], %s1383_s13, %s1383_s13, %s1384_s14  }
  0x15   :  { %s1285_s19 = scalar_lea.hbm %s1664_s0, 2048 }
  0x16   :  { %p1286_p8 = scmp.ne.s32.totalorder %s1664_s0, %s1285_s19  ;;  %p1289_p9 = scmp.lt.u32.totalorder %s1285_s19, %s1664_s0 }
  0x18   :  { %p1291_p10 = pnand %p1289_p9, %p1286_p8 }
  0x1a   :  { %1294 = shalt.err (!%p1291_p10)
}
  0x1b   :  { %s1295_s24 = scalar_lea.vmem %s1428_s27, 2048  ;;  %p1300_p12 = scmp.lt.s32.totalorder %s1428_s27, %s1428_s27 }
  0x1c   :  { %p1296_p11 = scmp.ne.s32.totalorder %s1428_s27, %s1295_s24  ;;  %p1301_p13 = scmp.lt.s32.totalorder %s1295_s24, %s1295_s24 }
  0x1e   :  { %p1302_p0 = por %p1301_p13, %p1300_p12 }
  0x20   :  { %p1303_p1 = pnand %p1302_p0, %p1296_p11 }
  0x22   :  { %1306 = shalt.err (!%p1303_p1)
}
  0x23   :  { %27 = dma.hbm_to_vmem [thread:$0]  %s1664_s0, 2048, %s1428_s27, [#allocation3], %s1383_s13, %s1383_s13, %s1384_s14  }
  0x24   :  { %s1385_s26 = smov [#allocation7]   ;;  %s1386_s29 = smov [#allocation8]  }
  0x25   :  { %s47_s28 = sshll.u32 %s1385_s26, 4  ;;  %s61_s30 = sshll.u32 %s1386_s29, 4  ;;  %s48_s28 = int_to_ptr.vmem [resolvable:$true] %s47_s28  ;;  %s1465_s30 = int_to_ptr.vmem [resolvable:$true] %s61_s30 }
  0x26   :  { %s1307_s10 = scalar_lea.hbm %s1667_s3, 2048 }
  0x27   :  { %p1308_p2 = scmp.ne.s32.totalorder %s1667_s3, %s1307_s10  ;;  %p1311_p3 = scmp.lt.u32.totalorder %s1307_s10, %s1667_s3 }
  0x29   :  { %p1313_p4 = pnand %p1311_p3, %p1308_p2 }
  0x2b   :  { %1316 = shalt.err (!%p1313_p4)
}
  0x2c   :  { %s1317_s0 = scalar_lea.vmem %s48_s28, 2048  ;;  %p1322_p6 = scmp.lt.s32.totalorder %s48_s28, %s48_s28 }
  0x2d   :  { %p1318_p5 = scmp.ne.s32.totalorder %s48_s28, %s1317_s0  ;;  %p1323_p7 = scmp.lt.s32.totalorder %s1317_s0, %s1317_s0 }
  0x2f   :  { %p1324_p8 = por %p1323_p7, %p1322_p6 }
  0x31   :  { %p1325_p9 = pnand %p1324_p8, %p1318_p5 }
  0x33   :  { %1328 = shalt.err (!%p1325_p9)
}
  0x34   :  { %53 = dma.hbm_to_vmem [thread:$0]  %s1667_s3, 2048, %s48_s28, [#allocation6], %s1383_s13, %s1383_s13, %s1384_s14  }
  0x35   :  { %s1329_s20 = scalar_lea.hbm %s1669_s5, 2048 }
  0x36   :  { %p1330_p10 = scmp.ne.s32.totalorder %s1669_s5, %s1329_s20  ;;  %p1333_p11 = scmp.lt.u32.totalorder %s1329_s20, %s1669_s5 }
  0x38   :  { %p1335_p12 = pnand %p1333_p11, %p1330_p10 }
  0x3a   :  { %1338 = shalt.err (!%p1335_p12)
}
  0x3b   :  { %s1339_s1 = scalar_lea.vmem %s1465_s30, 2048  ;;  %p1344_p0 = scmp.lt.s32.totalorder %s1465_s30, %s1465_s30 }
  0x3c   :  { %p1340_p13 = scmp.ne.s32.totalorder %s1465_s30, %s1339_s1  ;;  %p1345_p1 = scmp.lt.s32.totalorder %s1339_s1, %s1339_s1 }
  0x3e   :  { %p1346_p2 = por %p1345_p1, %p1344_p0 }
  0x40   :  { %p1347_p3 = pnand %p1346_p2, %p1340_p13 }
  0x42   :  { %1350 = shalt.err (!%p1347_p3)
}
  0x43   :  { %67 = dma.hbm_to_vmem [thread:$0]  %s1669_s5, 2048, %s1465_s30, [#allocation9], %s1383_s13, %s1383_s13, %s1384_s14  }
  0x44   :  { %1373 = dma.done.wait [#allocation3], 2048  }
  0x45   :  { %1374 = vsyncadd [#allocation3], 4294965248 }
  0x46   :  { %1375 = dma.done.wait [#allocation6], 4096  }
  0x47   :  { %1376 = vsyncadd [#allocation6], 4294963200 }
  0x48   :  { %1377 = dma.done.wait [#allocation9], 2048  }
  0x49   :  { %1378 = vsyncadd [#allocation9], 4294965248  ;;  %v98_v0 = vld [vmem:[#allocation5] sm:$0xff]  ;;  %v99_v1 = vld [vmem:[#allocation5 + $0x8] sm:$0xff] }
  0x4a   :  { %v100_v2 = vld [vmem:[#allocation5 + $0x10] sm:$0xff]  ;;  %v1080_v3 = vpack.c.bf16 %v99_v1, %v98_v0  ;;  %v101_v4 = vld [vmem:[#allocation5 + $0x18] sm:$0xff]  ;;  %v102_v6 = vld [vmem:[#allocation5 + $0x20] sm:$0xff] }
  0x4b   :  { %v1084_v5 = vpack.c.bf16 %v101_v4, %v100_v2  ;;  %v103_v7 = vld [vmem:[#allocation5 + $0x28] sm:$0xff]  ;;  %v82_v9 = vld [vmem:[#allocation2] sm:$0xff]  ;;  %v104_v10 = vld [vmem:[#allocation5 + $0x30] sm:$0xff] }
  0x4c   :  { %1081 = vmatprep.subr.bf16.mxu0 %v1080_v3  ;;  %v1088_v8 = vpack.c.bf16 %v103_v7, %v102_v6  ;;  %v105_v11 = vld [vmem:[#allocation5 + $0x38] sm:$0xff]  ;;  %944 = vmatprep.mubr.f32.mxu0 %v82_v9  ;;  %v106_v13 = vld [vmem:[#allocation5 + $0x40] sm:$0xff]  ;;  %v107_v14 = vld [vmem:[#allocation5 + $0x48] sm:$0xff] }
  0x4d   :  { %1083 = vmatpush3.bf16.msra.mxu0 %v1080_v3  ;;  %v1092_v12 = vpack.c.bf16 %v105_v11, %v104_v10  ;;  %v282_v15 = vld [vmem:[#allocation7] sm:$0xff]  ;;  %v283_v16 = vld [vmem:[#allocation7 + $0x8] sm:$0xff]  ;;  %v284_v17 = vld [vmem:[#allocation7 + $0x10] sm:$0xff]  ;;  %v1096_v21 = vpack.c.bf16 %v107_v14, %v106_v13 }
  0x4e   :  { %1085 = vmatprep.subr.bf16.mxu0 %v1084_v5  ;;  %v285_v18 = vld [vmem:[#allocation7 + $0x18] sm:$0xff]  ;;  %v1112_v19 = vpack.c.bf16 %v283_v16, %v282_v15  ;;  %v286_v22 = vld [vmem:[#allocation7 + $0x20] sm:$0xff]  ;;  %v287_v23 = vld [vmem:[#allocation7 + $0x28] sm:$0xff] }
  0x4f   :  { %v1116_v20 = vpack.c.bf16 %v285_v18, %v284_v17  ;;  %v108_v24 = vld [vmem:[#allocation5 + $0x50] sm:$0xff]  ;;  %v109_v25 = vld [vmem:[#allocation5 + $0x58] sm:$0xff]  ;;  %v1120_v26 = vpack.c.bf16 %v287_v23, %v286_v22  ;;  %v110_v30 = vld [vmem:[#allocation5 + $0x60] sm:$0xff] }
  0x50   :  { %1113 = vmatprep.subr.bf16.mxu1 %v1112_v19  ;;  %v1100_v27 = vpack.c.bf16 %v109_v25, %v108_v24  ;;  %v288_v28 = vld [vmem:[#allocation7 + $0x30] sm:$0xff]  ;;  %v289_v29 = vld [vmem:[#allocation7 + $0x38] sm:$0xff]  ;;  %v111_v31 = vld [vmem:[#allocation5 + $0x68] sm:$0xff] }
  0x51   :  { %1087 = vmatpush3.bf16.msra.mxu0 %v1084_v5  ;;  %1115 = vmatpush3.bf16.msra.mxu1 %v1112_v19  ;;  %v1124_v32 = vpack.c.bf16 %v289_v29, %v288_v28  ;;  %v1104_v33 = vpack.c.bf16 %v111_v31, %v110_v30  ;;  %v290_v34 = vld [vmem:[#allocation7 + $0x40] sm:$0xff]  ;;  %v291_v35 = vld [vmem:[#allocation7 + $0x48] sm:$0xff]  ;;  %v112_v36 = vld [vmem:[#allocation5 + $0x70] sm:$0xff] }
  0x52   :  { %1089 = vmatprep.subr.bf16.mxu0 %v1088_v8  ;;  %1117 = vmatprep.subr.bf16.mxu1 %v1116_v20  ;;  %v113_v37 = vld [vmem:[#allocation5 + $0x78] sm:$0xff]  ;;  %v1128_v38 = vpack.c.bf16 %v291_v35, %v290_v34  ;;  %v292_v40 = vld [vmem:[#allocation7 + $0x50] sm:$0xff]  ;;  %v294_v43 = vld [vmem:[#allocation7 + $0x60] sm:$0xff] }
  0x53   :  { %v1108_v39 = vpack.c.bf16 %v113_v37, %v112_v36  ;;  %v293_v41 = vld [vmem:[#allocation7 + $0x58] sm:$0xff]  ;;  %v295_v44 = vld [vmem:[#allocation7 + $0x68] sm:$0xff]  ;;  %v84_v47 = vld [vmem:[#allocation2 + $0x10] sm:$0xff] }
  0x54   :  { %v1132_v42 = vpack.c.bf16 %v293_v41, %v292_v40  ;;  %v83_v45 = vld [vmem:[#allocation2 + $0x8] sm:$0xff]  ;;  %v1136_v46 = vpack.c.bf16 %v295_v44, %v294_v43  ;;  %v85_v48 = vld [vmem:[#allocation2 + $0x18] sm:$0xff]  ;;  %v86_v49 = vld [vmem:[#allocation2 + $0x20] sm:$0xff] }
  0x55   :  { %1091 = vmatpush3.bf16.msra.mxu0 %v1088_v8  ;;  %1119 = vmatpush3.bf16.msra.mxu1 %v1116_v20  ;;  %v87_v50 = vld [vmem:[#allocation2 + $0x28] sm:$0xff]  ;;  %v88_v51 = vld [vmem:[#allocation2 + $0x30] sm:$0xff]  ;;  %v89_v52 = vld [vmem:[#allocation2 + $0x38] sm:$0xff] }
  0x56   :  { %1093 = vmatprep.subr.bf16.mxu0 %v1092_v12  ;;  %1121 = vmatprep.subr.bf16.mxu1 %v1120_v26  ;;  %v90_v53 = vld [vmem:[#allocation2 + $0x40] sm:$0xff]  ;;  %v91_v54 = vld [vmem:[#allocation2 + $0x48] sm:$0xff]  ;;  %v92_v55 = vld [vmem:[#allocation2 + $0x50] sm:$0xff] }
  0x57   :  { %v93_v56 = vld [vmem:[#allocation2 + $0x58] sm:$0xff]  ;;  %v94_v57 = vld [vmem:[#allocation2 + $0x60] sm:$0xff]  ;;  %v95_v58 = vld [vmem:[#allocation2 + $0x68] sm:$0xff] }
  0x58   :  { %v96_v59 = vld [vmem:[#allocation2 + $0x70] sm:$0xff]  ;;  %v97_v60 = vld [vmem:[#allocation2 + $0x78] sm:$0xff]  ;;  %v466_v0 = vld [vmem:[#allocation8] sm:$0xff] }
  0x59   :  { %1095 = vmatpush3.bf16.msra.mxu0 %v1092_v12  ;;  %1123 = vmatpush3.bf16.msra.mxu1 %v1120_v26  ;;  %v296_v61 = vld [vmem:[#allocation7 + $0x70] sm:$0xff]  ;;  %v297_v62 = vld [vmem:[#allocation7 + $0x78] sm:$0xff]  ;;  %v467_v1 = vld [vmem:[#allocation8 + $0x8] sm:$0xff] }
  0x5a   :  { %1097 = vmatprep.subr.bf16.mxu0 %v1096_v21  ;;  %1125 = vmatprep.subr.bf16.mxu1 %v1124_v32  ;;  %v1140_v63 = vpack.c.bf16 %v297_v62, %v296_v61  ;;  %v468_v2 = vld [vmem:[#allocation8 + $0x10] sm:$0xff]  ;;  %v1144_v3 = vpack.c.bf16 %v467_v1, %v466_v0  ;;  %v469_v4 = vld [vmem:[#allocation8 + $0x18] sm:$0xff]  ;;  %v470_v6 = vld [vmem:[#allocation8 + $0x20] sm:$0xff] }
  0x5b   :  { %v1148_v5 = vpack.c.bf16 %v469_v4, %v468_v2  ;;  %v471_v7 = vld [vmem:[#allocation8 + $0x28] sm:$0xff]  ;;  %v472_v9 = vld [vmem:[#allocation8 + $0x30] sm:$0xff]  ;;  %v473_v10 = vld [vmem:[#allocation8 + $0x38] sm:$0xff] }
  0x5c   :  { %v1152_v8 = vpack.c.bf16 %v471_v7, %v470_v6  ;;  %v1502_v11 = vpack.c.bf16 %v473_v10, %v472_v9  ;;  %v474_v12 = vld [vmem:[#allocation8 + $0x40] sm:$0xff]  ;;  %v475_v13 = vld [vmem:[#allocation8 + $0x48] sm:$0xff]  ;;  %v476_v15 = vld [vmem:[#allocation8 + $0x50] sm:$0xff] }
  0x5d   :  { %1099 = vmatpush3.bf16.msra.mxu0 %v1096_v21  ;;  %1127 = vmatpush3.bf16.msra.mxu1 %v1124_v32  ;;  %v1505_v14 = vpack.c.bf16 %v475_v13, %v474_v12  ;;  %v477_v16 = vld [vmem:[#allocation8 + $0x58] sm:$0xff]  ;;  %v478_v18 = vld [vmem:[#allocation8 + $0x60] sm:$0xff]  ;;  %v479_v19 = vld [vmem:[#allocation8 + $0x68] sm:$0xff] }
  0x5e   :  { %1101 = vmatprep.subr.bf16.mxu0 %v1100_v27  ;;  %1129 = vmatprep.subr.bf16.mxu1 %v1128_v38  ;;  %v1509_v17 = vpack.c.bf16 %v477_v16, %v476_v15  ;;  %v1513_v20 = vpack.c.bf16 %v479_v19, %v478_v18  ;;  %v1521_v21 = vld [vmem:[%s1666_s2] ss:$0 sm:$0xff]  ;;  %v480_v6 = vld [vmem:[#allocation8 + $0x70] sm:$0xff]  ;;  %v481_v7 = vld [vmem:[#allocation8 + $0x78] sm:$0xff] }
  0x5f   :  { %v814_v9 = vld [vmem:[%s1668_s4] ss:$0 sm:$0xff] }
  0x61   :  { %1103 = vmatpush3.bf16.msra.mxu0 %v1100_v27  ;;  %1131 = vmatpush3.bf16.msra.mxu1 %v1128_v38 }
  0x62   :  { %1105 = vmatprep.subr.bf16.mxu0 %v1104_v33  ;;  %1133 = vmatprep.subr.bf16.mxu1 %v1132_v42 }
  0x65   :  { %1107 = vmatpush3.bf16.msra.mxu0 %v1104_v33  ;;  %1135 = vmatpush3.bf16.msra.mxu1 %v1132_v42 }
  0x66   :  { %1109 = vmatprep.subr.bf16.mxu0 %v1108_v39  ;;  %1137 = vmatprep.subr.bf16.mxu1 %v1136_v46 }
  0x69   :  { %1111 = vmatpush3.bf16.msra.mxu0 %v1108_v39  ;;  %1139 = vmatpush3.bf16.msra.mxu1 %v1136_v46 }
  0x6a   :  { %1141 = vmatprep.subr.bf16.mxu1 %v1140_v63  ;;  %1145 = vmatprep.subr.bf16.mxu0 %v1144_v3 }
  0x6c   :  { %945 = vmatmul.mubr.f32.vlgmr.msra.gmra.mrb[0].mxu0 %v83_v45 }
  0x6d   :  { %947 = vmatprep.mubr.f32.mxu0 %v84_v47  ;;  %1143 = vmatpush3.bf16.msra.mxu1 %v1140_v63 }
  0x6e   :  { %1176 = vmatprep.subr.bf16.mxu1 %v1144_v3  ;;  %1147 = vmatpush3.bf16.msra.mxu0 %v1144_v3 }
  0x6f   :  { %1149 = vmatprep.subr.bf16.mxu0 %v1148_v5 }
  0x70   :  { %948 = vmatmul.mubr.f32.gmra.mrb[2].mxu0 %v85_v48 }
  0x71   :  { %950 = vmatprep.mubr.f32.mxu0 %v86_v49 }
  0x72   :  { %1151 = vmatpush3.bf16.msra.mxu0 %v1148_v5 }
  0x73   :  { %1153 = vmatprep.subr.bf16.mxu0 %v1152_v8 }
  0x74   :  { %951 = vmatmul.mubr.f32.gmra.mrb[4].mxu0 %v87_v50 }
  0x75   :  { %953 = vmatprep.mubr.f32.mxu0 %v88_v51 }
  0x76   :  { %1155 = vmatpush3.bf16.msra.mxu0 %v1152_v8 }
  0x77   :  { %1157 = vmatprep.subr.bf16.mxu0 %v1502_v11 }
  0x78   :  { %954 = vmatmul.mubr.f32.gmra.mrb[6].mxu0 %v89_v52 }
  0x79   :  { %956 = vmatprep.mubr.f32.mxu0 %v90_v53 }
  0x7a   :  { %1159 = vmatpush3.bf16.msra.mxu0 %v1502_v11 }
  0x7b   :  { %1161 = vmatprep.subr.bf16.mxu0 %v1505_v14 }
  0x7c   :  { %957 = vmatmul.mubr.f32.gmra.mrb[8].mxu0 %v91_v54 }
  0x7d   :  { %959 = vmatprep.mubr.f32.mxu0 %v92_v55 }
  0x7e   :  { %1163 = vmatpush3.bf16.msra.mxu0 %v1505_v14 }
  0x7f   :  { %1165 = vmatprep.subr.bf16.mxu0 %v1509_v17 }
  0x80   :  { %960 = vmatmul.mubr.f32.gmra.mrb[10].mxu0 %v93_v56 }
  0x81   :  { %962 = vmatprep.mubr.f32.mxu0 %v94_v57 }
  0x82   :  { %1167 = vmatpush3.bf16.msra.mxu0 %v1509_v17 }
  0x83   :  { %1169 = vmatprep.subr.bf16.mxu0 %v1513_v20 }
  0x84   :  { %963 = vmatmul.mubr.f32.gmra.mrb[12].mxu0 %v95_v58 }
  0x85   :  { %965 = vmatprep.mubr.f32.mxu0 %v96_v59 }
  0x86   :  { %1171 = vmatpush3.bf16.msra.mxu0 %v1513_v20 }
  0x88   :  { %966 = vmatmul.mubr.f32.gmra.mrb[14].mxu0 %v97_v60 }
 0x13f   :  { %v946_v22 = vpop.f32.mrb[0].mxu0 }
 0x140   :  { %v193_v23 = vadd.f32 %v946_v22, %v1521_v21  ;;  %v187_v24 = vpop.f32.mrb[1].mxu0 }
 0x141   :  { %v188_v25 = vadd.f32 %v1521_v21, %v187_v24 }
 0x142   :  { %v267_v28 = vmax.f32 %v193_v23, 0.0 }
 0x143   :  { %v949_v26 = vpop.f32.mrb[2].mxu0  ;;  %v266_v27 = vmax.f32 %v188_v25, 0.0 }
 0x144   :  { %v203_v29 = vadd.f32 %v949_v26, %v1521_v21  ;;  %v197_v30 = vpop.f32.mrb[3].mxu0 }
 0x145   :  { %v198_v31 = vadd.f32 %v1521_v21, %v197_v30  ;;  %1000 = vmatprep.mubr.f32.mxu1 %v266_v27 }
 0x146   :  { %1001 = vmatmul.mubr.f32.vlgmr.msra.gmra.mrb[0].mxu1 %v267_v28  ;;  %v269_v34 = vmax.f32 %v203_v29, 0.0 }
 0x147   :  { %v268_v32 = vmax.f32 %v198_v31, 0.0  ;;  %v952_v33 = vpop.f32.mrb[4].mxu0  ;;  %1184 = vmatpush3.bf16.msra.mxu1 %v1144_v3 }
 0x148   :  { %v213_v35 = vadd.f32 %v952_v33, %v1521_v21  ;;  %v207_v36 = vpop.f32.mrb[5].mxu0  ;;  %1177 = vmatprep.subr.bf16.mxu1 %v1148_v5 }
 0x149   :  { %v208_v37 = vadd.f32 %v1521_v21, %v207_v36  ;;  %1003 = vmatprep.mubr.f32.mxu1 %v268_v32 }
 0x14a   :  { %v271_v38 = vmax.f32 %v213_v35, 0.0  ;;  %1004 = vmatmul.mubr.f32.gmra.mrb[2].mxu1 %v269_v34 }
 0x14b   :  { %v270_v39 = vmax.f32 %v208_v37, 0.0  ;;  %v955_v40 = vpop.f32.mrb[6].mxu0  ;;  %1185 = vmatpush3.bf16.msra.mxu1 %v1148_v5 }
 0x14c   :  { %v223_v41 = vadd.f32 %v955_v40, %v1521_v21  ;;  %v217_v42 = vpop.f32.mrb[7].mxu0  ;;  %1178 = vmatprep.subr.bf16.mxu1 %v1152_v8 }
 0x14d   :  { %v218_v43 = vadd.f32 %v1521_v21, %v217_v42  ;;  %1006 = vmatprep.mubr.f32.mxu1 %v270_v39 }
 0x14e   :  { %v273_v44 = vmax.f32 %v223_v41, 0.0  ;;  %1007 = vmatmul.mubr.f32.gmra.mrb[4].mxu1 %v271_v38 }
 0x14f   :  { %v272_v45 = vmax.f32 %v218_v43, 0.0  ;;  %v958_v46 = vpop.f32.mrb[8].mxu0  ;;  %1186 = vmatpush3.bf16.msra.mxu1 %v1152_v8  ;;  %v1172_v8 = vpack.c.bf16 %v481_v7, %v480_v6 }
 0x150   :  { %v233_v47 = vadd.f32 %v958_v46, %v1521_v21  ;;  %v227_v48 = vpop.f32.mrb[9].mxu0  ;;  %1179 = vmatprep.subr.bf16.mxu1 %v1502_v11 }
 0x151   :  { %v228_v49 = vadd.f32 %v1521_v21, %v227_v48  ;;  %1009 = vmatprep.mubr.f32.mxu1 %v272_v45  ;;  %1173 = vmatprep.subr.bf16.mxu0 %v1172_v8 }
 0x152   :  { %v275_v50 = vmax.f32 %v233_v47, 0.0  ;;  %1010 = vmatmul.mubr.f32.gmra.mrb[6].mxu1 %v273_v44  ;;  %1175 = vmatpush3.bf16.msra.mxu0 %v1172_v8 }
 0x153   :  { %v274_v51 = vmax.f32 %v228_v49, 0.0  ;;  %v961_v52 = vpop.f32.mrb[10].mxu0  ;;  %1187 = vmatpush3.bf16.msra.mxu1 %v1502_v11 }
 0x154   :  { %v243_v53 = vadd.f32 %v961_v52, %v1521_v21  ;;  %v237_v54 = vpop.f32.mrb[11].mxu0  ;;  %1180 = vmatprep.subr.bf16.mxu1 %v1505_v14 }
 0x155   :  { %v238_v55 = vadd.f32 %v1521_v21, %v237_v54  ;;  %1012 = vmatprep.mubr.f32.mxu1 %v274_v51 }
 0x156   :  { %v277_v56 = vmax.f32 %v243_v53, 0.0  ;;  %1013 = vmatmul.mubr.f32.gmra.mrb[8].mxu1 %v275_v50 }
 0x157   :  { %v276_v57 = vmax.f32 %v238_v55, 0.0  ;;  %v964_v58 = vpop.f32.mrb[12].mxu0  ;;  %1188 = vmatpush3.bf16.msra.mxu1 %v1505_v14 }
 0x158   :  { %v253_v59 = vadd.f32 %v964_v58, %v1521_v21  ;;  %v247_v60 = vpop.f32.mrb[13].mxu0  ;;  %1181 = vmatprep.subr.bf16.mxu1 %v1509_v17  ;;  %v815_v58 = vld [vmem:[%s1670_s6] ss:$0 sm:$0xff]  ;;  %s1387_s6 = smov [#allocation10]  }
 0x159   :  { %v248_v61 = vadd.f32 %v1521_v21, %v247_v60  ;;  %1015 = vmatprep.mubr.f32.mxu1 %v276_v57  ;;  %s799_s30 = sshll.u32 %s1387_s6, 4  ;;  %s800_s30 = int_to_ptr.vmem [resolvable:$true] %s799_s30 }
 0x15a   :  { %v279_v62 = vmax.f32 %v253_v59, 0.0  ;;  %1016 = vmatmul.mubr.f32.gmra.mrb[10].mxu1 %v277_v56  ;;  %s1351_s8 = scalar_lea.vmem %s800_s30, 2048  ;;  %p1356_p5 = scmp.lt.s32.totalorder %s800_s30, %s800_s30 }
 0x15b   :  { %v278_v63 = vmax.f32 %v248_v61, 0.0  ;;  %v967_v0 = vpop.f32.mrb[14].mxu0  ;;  %1189 = vmatpush3.bf16.msra.mxu1 %v1509_v17  ;;  %p1352_p4 = scmp.ne.s32.totalorder %s800_s30, %s1351_s8  ;;  %p1357_p6 = scmp.lt.s32.totalorder %s1351_s8, %s1351_s8 }
 0x15c   :  { %v263_v1 = vadd.f32 %v967_v0, %v1521_v21  ;;  %v257_v2 = vpop.f32.mrb[15].mxu0  ;;  %1182 = vmatprep.subr.bf16.mxu1 %v1513_v20 }
 0x15d   :  { %v258_v3 = vadd.f32 %v1521_v21, %v257_v2  ;;  %1018 = vmatprep.mubr.f32.mxu1 %v278_v63  ;;  %p1358_p7 = por %p1357_p6, %p1356_p5 }
 0x15e   :  { %v281_v4 = vmax.f32 %v263_v1, 0.0  ;;  %1019 = vmatmul.mubr.f32.gmra.mrb[12].mxu1 %v279_v62 }
 0x15f   :  { %v280_v5 = vmax.f32 %v258_v3, 0.0  ;;  %1190 = vmatpush3.bf16.msra.mxu1 %v1513_v20  ;;  %p1359_p8 = pnand %p1358_p7, %p1352_p4 }
 0x160   :  { %1183 = vmatprep.subr.bf16.mxu1 %v1172_v8 }
 0x161   :  { %1021 = vmatprep.mubr.f32.mxu1 %v280_v5 }
 0x162   :  { %1022 = vmatmul.mubr.f32.gmra.mrb[14].mxu1 %v281_v4 }
 0x163   :  { %1191 = vmatpush3.bf16.msra.mxu1 %v1172_v8 }
 0x219   :  { %v1002_v10 = vpop.f32.mrb[0].mxu1 }
 0x21a   :  { %v377_v11 = vadd.f32 %v1002_v10, %v814_v9  ;;  %v371_v12 = vpop.f32.mrb[1].mxu1 }
 0x21b   :  { %v372_v13 = vadd.f32 %v814_v9, %v371_v12 }
 0x21c   :  { %v451_v16 = vmax.f32 %v377_v11, 0.0 }
 0x21d   :  { %v450_v14 = vmax.f32 %v372_v13, 0.0  ;;  %v1005_v15 = vpop.f32.mrb[2].mxu1 }
 0x21e   :  { %v387_v17 = vadd.f32 %v1005_v15, %v814_v9  ;;  %v381_v18 = vpop.f32.mrb[3].mxu1 }
 0x21f   :  { %v382_v19 = vadd.f32 %v814_v9, %v381_v18  ;;  %1056 = vmatprep.mubr.f32.mxu0 %v450_v14 }
 0x220   :  { %1057 = vmatmul.mubr.f32.vlgmr.msra.gmra.mrb[16].mxu0 %v451_v16  ;;  %v453_v22 = vmax.f32 %v387_v17, 0.0 }
 0x221   :  { %v452_v20 = vmax.f32 %v382_v19, 0.0  ;;  %v1008_v21 = vpop.f32.mrb[4].mxu1 }
 0x222   :  { %v397_v23 = vadd.f32 %v1008_v21, %v814_v9  ;;  %v391_v24 = vpop.f32.mrb[5].mxu1 }
 0x223   :  { %v392_v25 = vadd.f32 %v814_v9, %v391_v24  ;;  %1059 = vmatprep.mubr.f32.mxu0 %v452_v20 }
 0x224   :  { %v455_v26 = vmax.f32 %v397_v23, 0.0  ;;  %1060 = vmatmul.mubr.f32.gmra.mrb[18].mxu0 %v453_v22 }
 0x225   :  { %v454_v27 = vmax.f32 %v392_v25, 0.0  ;;  %v1011_v28 = vpop.f32.mrb[6].mxu1 }
 0x226   :  { %v407_v29 = vadd.f32 %v1011_v28, %v814_v9  ;;  %v401_v30 = vpop.f32.mrb[7].mxu1 }
 0x227   :  { %v402_v31 = vadd.f32 %v814_v9, %v401_v30  ;;  %1062 = vmatprep.mubr.f32.mxu0 %v454_v27 }
 0x228   :  { %v457_v32 = vmax.f32 %v407_v29, 0.0  ;;  %1063 = vmatmul.mubr.f32.gmra.mrb[20].mxu0 %v455_v26 }
 0x229   :  { %v456_v33 = vmax.f32 %v402_v31, 0.0  ;;  %v1014_v34 = vpop.f32.mrb[8].mxu1 }
 0x22a   :  { %v417_v35 = vadd.f32 %v1014_v34, %v814_v9  ;;  %v411_v36 = vpop.f32.mrb[9].mxu1 }
 0x22b   :  { %v412_v37 = vadd.f32 %v814_v9, %v411_v36  ;;  %1065 = vmatprep.mubr.f32.mxu0 %v456_v33 }
 0x22c   :  { %v459_v38 = vmax.f32 %v417_v35, 0.0  ;;  %1066 = vmatmul.mubr.f32.gmra.mrb[22].mxu0 %v457_v32 }
 0x22d   :  { %v458_v39 = vmax.f32 %v412_v37, 0.0  ;;  %v1017_v40 = vpop.f32.mrb[10].mxu1 }
 0x22e   :  { %v427_v41 = vadd.f32 %v1017_v40, %v814_v9  ;;  %v421_v42 = vpop.f32.mrb[11].mxu1 }
 0x22f   :  { %v422_v43 = vadd.f32 %v814_v9, %v421_v42  ;;  %1068 = vmatprep.mubr.f32.mxu1 %v458_v39 }
 0x230   :  { %v461_v44 = vmax.f32 %v427_v41, 0.0  ;;  %1069 = vmatmul.mubr.f32.vlgmr.msra.gmra.mrb[16].mxu1 %v459_v38 }
 0x231   :  { %v460_v45 = vmax.f32 %v422_v43, 0.0  ;;  %v1020_v46 = vpop.f32.mrb[12].mxu1 }
 0x232   :  { %v437_v47 = vadd.f32 %v1020_v46, %v814_v9  ;;  %v431_v48 = vpop.f32.mrb[13].mxu1 }
 0x233   :  { %v432_v49 = vadd.f32 %v814_v9, %v431_v48  ;;  %1071 = vmatprep.mubr.f32.mxu1 %v460_v45 }
 0x234   :  { %v463_v50 = vmax.f32 %v437_v47, 0.0  ;;  %1072 = vmatmul.mubr.f32.gmra.mrb[18].mxu1 %v461_v44 }
 0x235   :  { %v462_v51 = vmax.f32 %v432_v49, 0.0  ;;  %v1023_v52 = vpop.f32.mrb[14].mxu1 }
 0x236   :  { %v447_v53 = vadd.f32 %v1023_v52, %v814_v9  ;;  %v441_v54 = vpop.f32.mrb[15].mxu1 }
 0x237   :  { %v442_v55 = vadd.f32 %v814_v9, %v441_v54  ;;  %1074 = vmatprep.mubr.f32.mxu1 %v462_v51 }
 0x238   :  { %v465_v56 = vmax.f32 %v447_v53, 0.0  ;;  %1075 = vmatmul.mubr.f32.gmra.mrb[20].mxu1 %v463_v50 }
 0x239   :  { %v464_v57 = vmax.f32 %v442_v55, 0.0 }
 0x23b   :  { %1077 = vmatprep.mubr.f32.mxu1 %v464_v57 }
 0x23c   :  { %1078 = vmatmul.mubr.f32.gmra.mrb[22].mxu1 %v465_v56 }
 0x2f3   :  { %v1058_v59 = vpop.f32.mrb[16].mxu0 }
 0x2f4   :  { %v561_v60 = vadd.f32 %v1058_v59, %v815_v58  ;;  %v555_v61 = vpop.f32.mrb[17].mxu0 }
 0x2f5   :  { %v556_v63 = vadd.f32 %v815_v58, %v555_v61 }
 0x2f6   :  { %636 = vmax.xlane.f32.xlu0 %v561_v60 }
 0x2f7   :  { %v1061_v62 = vpop.f32.mrb[18].mxu0 }
 0x2f8   :  { %v571_v0 = vadd.f32 %v1061_v62, %v815_v58  ;;  %v565_v1 = vpop.f32.mrb[19].mxu0 }
 0x2f9   :  { %v566_v3 = vadd.f32 %v815_v58, %v565_v1 }
 0x2fa   :  { %640 = vmax.xlane.f32.xlu1 %v571_v0  ;;  %634 = vmax.xlane.f32.xlu0 %v556_v63 }
 0x2fb   :  { %v1064_v2 = vpop.f32.mrb[20].mxu0 }
 0x2fc   :  { %v575_v4 = vpop.f32.mrb[21].mxu0  ;;  %v581_v7 = vadd.f32 %v1064_v2, %v815_v58 }
 0x2fd   :  { %v576_v5 = vadd.f32 %v815_v58, %v575_v4 }
 0x2fe   :  { %638 = vmax.xlane.f32.xlu1 %v566_v3 }
 0x2ff   :  { %v1067_v6 = vpop.f32.mrb[22].mxu0  ;;  %642 = vmax.xlane.f32.xlu0 %v576_v5 }
 0x300   :  { %v585_v8 = vpop.f32.mrb[23].mxu0  ;;  %v591_v11 = vadd.f32 %v1067_v6, %v815_v58 }
 0x301   :  { %v586_v9 = vadd.f32 %v815_v58, %v585_v8 }
 0x302   :  { %644 = vmax.xlane.f32.xlu1 %v581_v7 }
 0x303   :  { %v1070_v10 = vpop.f32.mrb[16].mxu1  ;;  %646 = vmax.xlane.f32.xlu0 %v586_v9 }
 0x304   :  { %v595_v12 = vpop.f32.mrb[17].mxu1  ;;  %v1556_v15 = vadd.f32 %v1070_v10, %v815_v58 }
 0x305   :  { %v1553_v13 = vadd.f32 %v815_v58, %v595_v12 }
 0x306   :  { %648 = vmax.xlane.f32.xlu1 %v591_v11 }
 0x307   :  { %v1073_v14 = vpop.f32.mrb[18].mxu1  ;;  %650 = vmax.xlane.f32.xlu0 %v1553_v13 }
 0x308   :  { %v605_v16 = vpop.f32.mrb[19].mxu1  ;;  %v1562_v19 = vadd.f32 %v1073_v14, %v815_v58 }
 0x309   :  { %v1558_v17 = vadd.f32 %v815_v58, %v605_v16 }
 0x30a   :  { %652 = vmax.xlane.f32.xlu1 %v1556_v15 }
 0x30b   :  { %v1076_v18 = vpop.f32.mrb[20].mxu1  ;;  %654 = vmax.xlane.f32.xlu0 %v1558_v17 }
 0x30c   :  { %v615_v20 = vpop.f32.mrb[21].mxu1  ;;  %v1568_v23 = vadd.f32 %v1076_v18, %v815_v58 }
 0x30d   :  { %v1564_v21 = vadd.f32 %v815_v58, %v615_v20 }
 0x30e   :  { %656 = vmax.xlane.f32.xlu1 %v1562_v19 }
 0x30f   :  { %v1079_v22 = vpop.f32.mrb[22].mxu1  ;;  %658 = vmax.xlane.f32.xlu0 %v1564_v21 }
 0x310   :  { %v625_v24 = vpop.f32.mrb[23].mxu1  ;;  %v1574_v26 = vadd.f32 %v1079_v22, %v815_v58 }
 0x311   :  { %v1570_v25 = vadd.f32 %v815_v58, %v625_v24 }
 0x312   :  { %660 = vmax.xlane.f32.xlu1 %v1568_v23 }
 0x313   :  { %662 = vmax.xlane.f32.xlu0 %v1570_v25 }
 0x316   :  { %664 = vmax.xlane.f32.xlu1 %v1574_v26 }
 0x383   :  { %v637_v27 = vpop.xlane.xlu0 %636 }
 0x384   :  { %v667_v28 = vsub.f32 %v561_v60, %v637_v27 }
 0x386   :  { %v684_v29 = vmul.f32 1.442695, %v667_v28 }
 0x387   :  { %v641_v30 = vpop.xlane.xlu1 %640  ;;  %v635_v31 = vpop.xlane.xlu0 %634 }
 0x388   :  { %1199 = vpow2.f32 %v684_v29  ;;  %v669_v32 = vsub.f32 %v571_v0, %v641_v30  ;;  %v666_v33 = vsub.f32 %v556_v63, %v635_v31 }
 0x38a   :  { %v688_v34 = vmul.f32 1.442695, %v669_v32  ;;  %v682_v35 = vmul.f32 1.442695, %v666_v33 }
 0x38b   :  { %v639_v36 = vpop.xlane.xlu1 %638 }
 0x38c   :  { %1201 = vpow2.f32 %v688_v34  ;;  %v668_v37 = vsub.f32 %v566_v3, %v639_v36  ;;  %v643_v38 = vpop.xlane.xlu0 %642 }
 0x38d   :  { %1203 = vpow2.f32 %v682_v35  ;;  %v670_v39 = vsub.f32 %v576_v5, %v643_v38 }
 0x38e   :  { %v686_v40 = vmul.f32 1.442695, %v668_v37 }
 0x38f   :  { %v645_v41 = vpop.xlane.xlu1 %644  ;;  %v690_v44 = vmul.f32 1.442695, %v670_v39 }
 0x390   :  { %1205 = vpow2.f32 %v686_v40  ;;  %v671_v42 = vsub.f32 %v581_v7, %v645_v41  ;;  %v647_v43 = vpop.xlane.xlu0 %646 }
 0x391   :  { %v672_v45 = vsub.f32 %v586_v9, %v647_v43 }
 0x392   :  { %v1577_v46 = vpop.eup %1199  ;;  %v692_v47 = vmul.f32 1.442695, %v671_v42 }
 0x393   :  { %716 = vadd.xlane.f32.xlu1 %v1577_v46  ;;  %v649_v48 = vpop.xlane.xlu1 %648  ;;  %v694_v51 = vmul.f32 1.442695, %v672_v45 }
 0x394   :  { %1207 = vpow2.f32 %v692_v47  ;;  %v673_v49 = vsub.f32 %v591_v11, %v649_v48  ;;  %v651_v50 = vpop.xlane.xlu0 %650 }
 0x395   :  { %1209 = vpow2.f32 %v690_v44  ;;  %v674_v52 = vsub.f32 %v1553_v13, %v651_v50 }
 0x396   :  { %v1581_v53 = vpop.eup %1201  ;;  %v696_v54 = vmul.f32 1.442695, %v673_v49 }
 0x397   :  { %v1583_v55 = vpop.eup %1203  ;;  %720 = vadd.xlane.f32.xlu1 %v1581_v53  ;;  %v653_v56 = vpop.xlane.xlu1 %652  ;;  %v698_v59 = vmul.f32 1.442695, %v674_v52 }
 0x398   :  { %1211 = vpow2.f32 %v696_v54  ;;  %v675_v57 = vsub.f32 %v1556_v15, %v653_v56  ;;  %714 = vadd.xlane.f32.xlu0 %v1583_v55  ;;  %v655_v58 = vpop.xlane.xlu0 %654 }
 0x399   :  { %1213 = vpow2.f32 %v694_v51  ;;  %v676_v60 = vsub.f32 %v1558_v17, %v655_v58 }
 0x39a   :  { %v1589_v61 = vpop.eup %1205  ;;  %v700_v62 = vmul.f32 1.442695, %v675_v57 }
 0x39b   :  { %v657_v63 = vpop.xlane.xlu1 %656  ;;  %v702_v2 = vmul.f32 1.442695, %v676_v60 }
 0x39c   :  { %1215 = vpow2.f32 %v700_v62  ;;  %v677_v0 = vsub.f32 %v1562_v19, %v657_v63  ;;  %718 = vadd.xlane.f32.xlu0 %v1589_v61  ;;  %v659_v1 = vpop.xlane.xlu0 %658 }
 0x39d   :  { %1217 = vpow2.f32 %v698_v59  ;;  %v678_v3 = vsub.f32 %v1564_v21, %v659_v1 }
 0x39e   :  { %v1594_v4 = vpop.eup %1207  ;;  %v704_v5 = vmul.f32 1.442695, %v677_v0 }
 0x39f   :  { %v1596_v6 = vpop.eup %1209  ;;  %724 = vadd.xlane.f32.xlu1 %v1594_v4  ;;  %v661_v7 = vpop.xlane.xlu1 %660  ;;  %v706_v10 = vmul.f32 1.442695, %v678_v3 }
 0x3a0   :  { %1219 = vpow2.f32 %v704_v5  ;;  %v679_v8 = vsub.f32 %v1568_v23, %v661_v7  ;;  %722 = vadd.xlane.f32.xlu0 %v1596_v6  ;;  %v663_v9 = vpop.xlane.xlu0 %662 }
 0x3a1   :  { %1221 = vpow2.f32 %v702_v2  ;;  %v680_v11 = vsub.f32 %v1570_v25, %v663_v9 }
 0x3a2   :  { %v1602_v12 = vpop.eup %1211  ;;  %v708_v13 = vmul.f32 1.442695, %v679_v8 }
 0x3a3   :  { %v1604_v14 = vpop.eup %1213  ;;  %728 = vadd.xlane.f32.xlu1 %v1602_v12  ;;  %v665_v15 = vpop.xlane.xlu1 %664  ;;  %v710_v17 = vmul.f32 1.442695, %v680_v11 }
 0x3a4   :  { %1223 = vpow2.f32 %v708_v13  ;;  %v681_v16 = vsub.f32 %v1574_v26, %v665_v15  ;;  %726 = vadd.xlane.f32.xlu0 %v1604_v14 }
 0x3a5   :  { %1225 = vpow2.f32 %v706_v10 }
 0x3a6   :  { %v1609_v18 = vpop.eup %1215  ;;  %v712_v19 = vmul.f32 1.442695, %v681_v16 }
 0x3a7   :  { %v1611_v20 = vpop.eup %1217  ;;  %732 = vadd.xlane.f32.xlu1 %v1609_v18 }
 0x3a8   :  { %1227 = vpow2.f32 %v712_v19  ;;  %730 = vadd.xlane.f32.xlu0 %v1611_v20 }
 0x3a9   :  { %1229 = vpow2.f32 %v710_v17 }
 0x3aa   :  { %v1615_v21 = vpop.eup %1219 }
 0x3ab   :  { %v1617_v22 = vpop.eup %1221  ;;  %736 = vadd.xlane.f32.xlu1 %v1615_v21 }
 0x3ac   :  { %734 = vadd.xlane.f32.xlu0 %v1617_v22 }
 0x3ae   :  { %v1621_v23 = vpop.eup %1223 }
 0x3af   :  { %v1623_v24 = vpop.eup %1225  ;;  %740 = vadd.xlane.f32.xlu1 %v1621_v23 }
 0x3b0   :  { %738 = vadd.xlane.f32.xlu0 %v1623_v24 }
 0x3b2   :  { %v1627_v25 = vpop.eup %1227 }
 0x3b3   :  { %v1629_v26 = vpop.eup %1229  ;;  %744 = vadd.xlane.f32.xlu1 %v1627_v25 }
 0x3b4   :  { %742 = vadd.xlane.f32.xlu0 %v1629_v26 }
 0x420   :  { %v717_v27 = vpop.xlane.xlu1 %716 }
 0x421   :  { %1231 = vrcp.f32 %v717_v27 }
 0x424   :  { %v721_v28 = vpop.xlane.xlu1 %720 }
 0x425   :  { %1233 = vrcp.f32 %v721_v28  ;;  %v715_v29 = vpop.xlane.xlu0 %714 }
 0x426   :  { %1235 = vrcp.f32 %v715_v29 }
 0x429   :  { %v719_v30 = vpop.xlane.xlu0 %718 }
 0x42a   :  { %1237 = vrcp.f32 %v719_v30 }
 0x42b   :  { %v1232_v31 = vpop.eup %1231 }
 0x42c   :  { %v763_v32 = vmul.f32 %v1232_v31, %v1577_v46  ;;  %v725_v33 = vpop.xlane.xlu1 %724 }
 0x42d   :  { %1239 = vrcp.f32 %v725_v33  ;;  %v723_v34 = vpop.xlane.xlu0 %722 }
 0x42e   :  { %779 = vst [vmem:[#allocation10 + $0x8] sm:$0xff] %v763_v32  ;;  %1241 = vrcp.f32 %v723_v34 }
 0x42f   :  { %v1234_v35 = vpop.eup %1233 }
 0x430   :  { %v1236_v36 = vpop.eup %1235  ;;  %v765_v37 = vmul.f32 %v1234_v35, %v1581_v53  ;;  %v729_v38 = vpop.xlane.xlu1 %728 }
 0x431   :  { %v762_v39 = vmul.f32 %v1236_v36, %v1583_v55  ;;  %1243 = vrcp.f32 %v729_v38  ;;  %v727_v40 = vpop.xlane.xlu0 %726 }
 0x432   :  { %781 = vst [vmem:[#allocation10 + $0x18] sm:$0xff] %v765_v37  ;;  %1245 = vrcp.f32 %v727_v40 }
 0x433   :  { %778 = vst [vmem:[#allocation10] sm:$0xff] %v762_v39 }
 0x434   :  { %v1238_v41 = vpop.eup %1237  ;;  %v733_v42 = vpop.xlane.xlu1 %732 }
 0x435   :  { %v764_v43 = vmul.f32 %v1238_v41, %v1589_v61  ;;  %1247 = vrcp.f32 %v733_v42  ;;  %v731_v44 = vpop.xlane.xlu0 %730 }
 0x436   :  { %1249 = vrcp.f32 %v731_v44 }
 0x437   :  { %v1240_v45 = vpop.eup %1239  ;;  %780 = vst [vmem:[#allocation10 + $0x10] sm:$0xff] %v764_v43 }
 0x438   :  { %v1242_v46 = vpop.eup %1241  ;;  %v767_v47 = vmul.f32 %v1240_v45, %v1594_v4  ;;  %v737_v48 = vpop.xlane.xlu1 %736 }
 0x439   :  { %v766_v49 = vmul.f32 %v1242_v46, %v1596_v6  ;;  %1251 = vrcp.f32 %v737_v48  ;;  %v735_v50 = vpop.xlane.xlu0 %734 }
 0x43a   :  { %783 = vst [vmem:[#allocation10 + $0x28] sm:$0xff] %v767_v47  ;;  %1253 = vrcp.f32 %v735_v50 }
 0x43b   :  { %v1244_v51 = vpop.eup %1243  ;;  %782 = vst [vmem:[#allocation10 + $0x20] sm:$0xff] %v766_v49 }
 0x43c   :  { %v1246_v52 = vpop.eup %1245  ;;  %v769_v53 = vmul.f32 %v1244_v51, %v1602_v12  ;;  %v741_v54 = vpop.xlane.xlu1 %740 }
 0x43d   :  { %v768_v55 = vmul.f32 %v1246_v52, %v1604_v14  ;;  %1255 = vrcp.f32 %v741_v54  ;;  %v739_v56 = vpop.xlane.xlu0 %738 }
 0x43e   :  { %785 = vst [vmem:[#allocation10 + $0x38] sm:$0xff] %v769_v53  ;;  %1257 = vrcp.f32 %v739_v56 }
 0x43f   :  { %v1248_v57 = vpop.eup %1247  ;;  %784 = vst [vmem:[#allocation10 + $0x30] sm:$0xff] %v768_v55 }
 0x440   :  { %v1250_v58 = vpop.eup %1249  ;;  %v771_v59 = vmul.f32 %v1248_v57, %v1609_v18  ;;  %v745_v60 = vpop.xlane.xlu1 %744 }
 0x441   :  { %v770_v61 = vmul.f32 %v1250_v58, %v1611_v20  ;;  %1259 = vrcp.f32 %v745_v60  ;;  %v743_v62 = vpop.xlane.xlu0 %742 }
 0x442   :  { %787 = vst [vmem:[#allocation10 + $0x48] sm:$0xff] %v771_v59  ;;  %1261 = vrcp.f32 %v743_v62 }
 0x443   :  { %v1252_v63 = vpop.eup %1251  ;;  %786 = vst [vmem:[#allocation10 + $0x40] sm:$0xff] %v770_v61 }
 0x444   :  { %v1254_v0 = vpop.eup %1253  ;;  %v773_v1 = vmul.f32 %v1252_v63, %v1615_v21 }
 0x445   :  { %v772_v2 = vmul.f32 %v1254_v0, %v1617_v22 }
 0x446   :  { %789 = vst [vmem:[#allocation10 + $0x58] sm:$0xff] %v773_v1 }
 0x447   :  { %v1256_v3 = vpop.eup %1255  ;;  %788 = vst [vmem:[#allocation10 + $0x50] sm:$0xff] %v772_v2 }
 0x448   :  { %v1258_v4 = vpop.eup %1257  ;;  %v775_v5 = vmul.f32 %v1256_v3, %v1621_v23 }
 0x449   :  { %v774_v6 = vmul.f32 %v1258_v4, %v1623_v24 }
 0x44a   :  { %791 = vst [vmem:[#allocation10 + $0x68] sm:$0xff] %v775_v5 }
 0x44b   :  { %v1260_v7 = vpop.eup %1259  ;;  %790 = vst [vmem:[#allocation10 + $0x60] sm:$0xff] %v774_v6 }
 0x44c   :  { %v1262_v8 = vpop.eup %1261  ;;  %v777_v9 = vmul.f32 %v1260_v7, %v1627_v25 }
 0x44d   :  { %v776_v10 = vmul.f32 %v1262_v8, %v1629_v26 }
 0x44e   :  { %793 = vst [vmem:[#allocation10 + $0x78] sm:$0xff] %v777_v9 }
 0x44f   :  { %792 = vst [vmem:[#allocation10 + $0x70] sm:$0xff] %v776_v10 }
 0x450   :  { %1362 = shalt.err (!%p1359_p8)
}
 0x451   :  { %s1363_s11 = scalar_lea.hbm %s1671_s7, 2048 }
 0x452   :  { %p1364_p9 = scmp.ne.s32.totalorder %s1671_s7, %s1363_s11  ;;  %p1367_p10 = scmp.lt.u32.totalorder %s1363_s11, %s1671_s7 }
 0x454   :  { %p1369_p11 = pnand %p1367_p10, %p1364_p9 }
 0x456   :  { %1372 = shalt.err (!%p1369_p11)
}
 0x457   :  { %805 = dma.vmem_to_hbm [thread:$0]  %s800_s30, 2048, %s1671_s7, [#allocation4], %s1383_s13, %s1383_s13, %s1384_s14  }
 0x458   :  { %1379 = dma.done.wait [#allocation4], 2048  }
 0x459   :  { %1380 = vsyncadd [#allocation4], 4294965248 }
 0x45a   :  { %809 = vsyncpa [#allocation3], 1 }
 0x45b   :  { %810 = vsyncpa [#allocation6], 1 }
 0x45c   :  { %811 = vsyncpa [#allocation9], 1 }
 0x45d   :  { %812 = vsyncpa [#allocation4], 1 }

</bundles_post_ra>
